<compile_context>
chip_gen: v5e
topology: v5e:2x2
jax: 0.10.0
libtpu: 0.0.40
codegen_flags: <defaults>
</compile_context>

<pallas_src>
import functools

import jax
import jax.numpy as jnp
from jax import lax
from jax.experimental import pallas as pl
from jax.experimental.pallas import tpu as pltpu


def transformer_block_kernel(
    v_ref, k_ref, q_ref, bias_ref,
    wv_ref, wk_ref, wq_ref,            # block-diag per-head projections, (E, E) bf16
    wfc_ref, bfc_ref,                  # fc_out: (E, E) bf16, (1, E) f32
    g1_ref, bt1_ref, g2_ref, bt2_ref,  # layernorm gamma/beta, (1, E) f32
    w1_ref, b1_ref, w2_ref, b2_ref,    # FFN: (E, F) bf16, (1, F) f32, (F, E) bf16, (1, E) f32
    o_ref,
    *, nb, seq, heads, head_dim, embed_size,
):
    f32 = jnp.float32
    bf16 = jnp.bfloat16
    rows = nb * seq

    # Flatten (NB, S, E) -> (NB*S, E): merging leading (sublane-major) dims is a cheap reshape.
    v16 = v_ref[...].reshape(rows, embed_size)        # bf16 inputs
    k16 = k_ref[...].reshape(rows, embed_size)
    q16 = q_ref[...].reshape(rows, embed_size)

    # --- SelfAttention projections (values <- k, keys <- v, queries <- q) ----------------
    values16 = jnp.dot(k16, wv_ref[...], preferred_element_type=f32).astype(bf16)
    keys16 = jnp.dot(v16, wk_ref[...], preferred_element_type=f32).astype(bf16)
    scale = 1.0 / (float(embed_size) ** 0.5)
    # Fold 1/sqrt(E) into the queries once (instead of scaling every (S,S) energy tile).
    queries16 = (jnp.dot(q16, wq_ref[...], preferred_element_type=f32) * scale).astype(bf16)

    # 3D views for batched-over-batch attention (leading-dim split only -> cheap reshape).
    q3 = queries16.reshape(nb, seq, embed_size)
    k3 = keys16.reshape(nb, seq, embed_size)
    v3 = values16.reshape(nb, seq, embed_size)

    # Additive mask bias: shipped bf16 from the wrapper, upcast once per grid step.
    bias = bias_ref[...].astype(f32)                                 # (NB, S, S)

    # --- per-head attention, batched over the NB batch elements.  The concat + fc_out is
    #     fused: attn_fc += head_out @ Wfc[h*D:(h+1)*D, :]  -> every output is a full
    #     lane-dense (rows, E) tile; no narrow per-head stores, no VMEM scratch. -----------
    attn_fc = jnp.zeros((rows, embed_size), f32)
    for h in range(heads):
        cs = slice(h * head_dim, (h + 1) * head_dim)
        qh = q3[:, :, cs]                                            # (NB, S, D) bf16
        kh = k3[:, :, cs]
        vh = v3[:, :, cs]
        energy = jnp.einsum('bqd,bkd->bqk', qh, kh,
                            preferred_element_type=f32)              # (NB, S, S) f32
        energy = energy + bias
        energy = energy - jnp.max(energy, axis=-1, keepdims=True)
        p = jnp.exp(energy)
        inv = pl.reciprocal(jnp.sum(p, axis=-1, keepdims=True), approx=True)
        p16 = (p * inv).astype(bf16)
        head_out = jnp.einsum('bqk,bkd->bqd', p16, vh,
                              preferred_element_type=f32)            # (NB, S, D) f32
        ho = head_out.reshape(rows, head_dim).astype(bf16)
        wfc_h = wfc_ref[pl.ds(h * head_dim, head_dim), :]            # (D, E) bf16 sublane slice
        attn_fc = attn_fc + jnp.dot(ho, wfc_h, preferred_element_type=f32)

    attn_out = attn_fc + bfc_ref[...]                                # (NB*S, E) f32

    # --- Add & LayerNorm 1 (rsqrt on the EUP) ---------------------------------------------
    x = attn_out + q16.astype(f32)
    mu = jnp.mean(x, axis=-1, keepdims=True)
    var = jnp.mean((x - mu) ** 2, axis=-1, keepdims=True)
    x = (x - mu) * lax.rsqrt(var + 1e-5) * g1_ref[...] + bt1_ref[...]

    # Dropout in eval mode is identity.
    drop = x

    # --- Feed-forward (bf16 operands, f32 accumulation) ------------------------------------
    h1 = jnp.dot(drop.astype(bf16), w1_ref[...], preferred_element_type=f32) + b1_ref[...]
    h1 = jnp.maximum(h1, 0.0)
    ff = jnp.dot(h1.astype(bf16), w2_ref[...], preferred_element_type=f32) + b2_ref[...]

    # --- Add & LayerNorm 2 -------------------------------------------------------------------
    y = ff + drop
    mu2 = jnp.mean(y, axis=-1, keepdims=True)
    var2 = jnp.mean((y - mu2) ** 2, axis=-1, keepdims=True)
    out = (y - mu2) * lax.rsqrt(var2 + 1e-5) * g2_ref[...] + bt2_ref[...]

    o_ref[...] = out.reshape(nb, seq, embed_size).astype(o_ref.dtype)


def _vmem_estimate_bytes(nb, S, E, F):
    """Rough per-grid-step VMEM footprint (bytes) for batch block nb."""
    bf, f4 = 2, 4
    acts_io = 2 * (3 * nb * S * E * bf)       # v/k/q blocks, double-buffered
    bias_io = 2 * (nb * S * S * bf)           # additive mask bias block, double-buffered
    out_io = 2 * (nb * S * E * f4)            # f32 output block, double-buffered
    weights = (4 * E * E + 2 * E * F) * bf + (6 * E + F) * f4   # single-buffered (Buffered(1))
    temps = (
        3 * nb * S * E * bf                   # projected q/k/v (bf16)
        + 2 * nb * S * S * f4                 # f32 bias + per-head energy/probs
        + 4 * nb * S * E * f4                 # attn_fc / x / ff / residual temporaries
        + nb * S * F * f4                     # FFN hidden (the big one)
    )
    return acts_io + bias_io + out_io + weights + temps


def _pick_batch_block(N, S, E, F, vmem_budget_bytes):
    """Largest divisor nb of N whose VMEM estimate fits the budget.

    nb is capped at N//2 (when N > 1) so the grid length stays >= 2 and
    dimension_semantics=("parallel",) can shard the batch axis across v7x's two TensorCores.
    (At production shapes also prefer nb such that nb*S is a multiple of 256 for the
    256-wide MXU on v6e/v7x.)
    """
    cap = N if N == 1 else max(1, N // 2)
    best = 1
    for nb in range(1, cap + 1):
        if N % nb:
            continue
        if _vmem_estimate_bytes(nb, S, E, F) <= vmem_budget_bytes:
            best = nb
    return best


def transformer_block(v, k, q, mask, params, *, heads, forward_exp, batch_block=None):
    N, S, E = q.shape
    assert E % heads == 0
    D = E // heads
    F = forward_exp * E

    # Generation-aware VMEM limit: ~96 MiB on v5e/v6e (128 MiB physical), ~48 MiB on v7x (64 MiB).
    try:
        vmem_cap = int(getattr(pltpu.get_tpu_info(), "vmem_capacity_bytes", 128 * 1024 * 1024))
    except Exception:
        vmem_cap = 128 * 1024 * 1024
    vmem_limit = min(100 * 1024 * 1024, int(0.75 * vmem_cap))

    nb = batch_block if batch_block is not None else _pick_batch_block(
        N, S, E, F, int(0.8 * vmem_limit))
    assert N % nb == 0

    # bf16 I/O: halves activation DMA.  Mask is converted once (wrapper-side) into an
    # additive bf16 bias: mask==0 -> -1e20, mask!=0 -> 0.
    v16 = v.astype(jnp.bfloat16)
    k16 = k.astype(jnp.bfloat16)
    q16 = q.astype(jnp.bfloat16)
    bias = jnp.where(mask == 0, jnp.float32(-1e20), jnp.float32(0.0)).astype(jnp.bfloat16)

    kernel = functools.partial(
        transformer_block_kernel,
        nb=nb, seq=S, heads=heads, head_dim=D, embed_size=E,
    )

    # Advisory cost hint for XLA's scheduler around the fused custom call.
    flops = (
        2 * N * S * E * E * 3        # q/k/v block-diag projections
        + 4 * N * S * S * E          # QK^T + PV over all heads
        + 2 * N * S * E * E          # fc_out
        + 4 * N * S * E * F          # FFN (two matmuls)
    )
    bytes_accessed = (
        3 * N * S * E * 2 + N * S * S * 2      # bf16 activations + bf16 bias in
        + N * S * E * 4                        # f32 output
        + (4 * E * E + 2 * E * F) * 2          # bf16 weights
        + (6 * E + F) * 4                      # f32 biases / LN params
    )
    cost = pl.CostEstimate(flops=int(flops),
                           transcendentals=int(N * heads * S * S),
                           bytes_accessed=int(bytes_accessed))

    def _const_spec(shape, mode):
        idx = lambda b, s=shape: tuple(0 for _ in s)
        if mode is None:
            return pl.BlockSpec(shape, idx)
        return pl.BlockSpec(shape, idx, pipeline_mode=mode)

    def _invoke(weight_mode):
        grid_spec = pltpu.PrefetchScalarGridSpec(
            num_scalar_prefetch=0,
            grid=(N // nb,),
            in_specs=[
                pl.BlockSpec((nb, S, E), lambda b: (b, 0, 0)),   # v (bf16)
                pl.BlockSpec((nb, S, E), lambda b: (b, 0, 0)),   # k (bf16)
                pl.BlockSpec((nb, S, E), lambda b: (b, 0, 0)),   # q (bf16)
                pl.BlockSpec((nb, S, S), lambda b: (b, 0, 0)),   # additive mask bias (bf16)
                _const_spec((E, E), weight_mode),    # wv block-diag (bf16)
                _const_spec((E, E), weight_mode),    # wk block-diag (bf16)
                _const_spec((E, E), weight_mode),    # wq block-diag (bf16)
                _const_spec((E, E), weight_mode),    # fc_out weight^T (bf16)
                _const_spec((1, E), weight_mode),    # fc_out bias (f32)
                _const_spec((1, E), weight_mode),    # norm1 gamma
                _const_spec((1, E), weight_mode),    # norm1 beta
                _const_spec((1, E), weight_mode),    # norm2 gamma
                _const_spec((1, E), weight_mode),    # norm2 beta
                _const_spec((E, F), weight_mode),    # ffn w1^T (bf16)
                _const_spec((1, F), weight_mode),    # ffn b1 (f32)
                _const_spec((F, E), weight_mode),    # ffn w2^T (bf16)
                _const_spec((1, E), weight_mode),    # ffn b2 (f32)
            ],
            out_specs=pl.BlockSpec((nb, S, E), lambda b: (b, 0, 0)),
        )
        return pl.pallas_call(
            kernel,
            out_shape=jax.ShapeDtypeStruct((N, S, E), jnp.float32),
            grid_spec=grid_spec,
            compiler_params=pltpu.CompilerParams(
                dimension_semantics=("parallel",),
                vmem_limit_bytes=vmem_limit,
            ),
            cost_estimate=cost,
        )(
            v16, k16, q16, bias,
            params["wv_bd"], params["wk_bd"], params["wq_bd"],
            params["wfc"], params["bfc"],
            params["g1"], params["bt1"], params["g2"], params["bt2"],
            params["w1"], params["b1"], params["w2"], params["b2"],
        )

    try:
        # Constant-index weight specs are single-buffered: revisited at block (0,0) every
        # grid step, so a second buffer is pure VMEM waste (~24 MiB at E=1024, F=4096).
        return _invoke(pl.Buffered(1))
    except Exception:
        # TODO(synk): drop this fallback once Buffered(1) single-buffering is supported
        # on every jax/libtpu build in use.
        return _invoke(None)


def make_params(key, embed_size, heads, forward_exp):
    D = embed_size // heads
    F = forward_exp * embed_size
    ks = jax.random.split(key, 8)
    init = lambda k, shape: (0.02 * jax.random.normal(k, shape)).astype(jnp.float32)

    wv = init(ks[0], (D, D))   # nn.Linear(D, D, bias=False).weight
    wk = init(ks[1], (D, D))
    wq = init(ks[2], (D, D))
    wfc = init(ks[3], (embed_size, embed_size))  # fc_out.weight
    bfc = init(ks[4], (embed_size,))
    w1 = init(ks[5], (F, embed_size))            # ff[0].weight
    b1 = jnp.zeros((F,), jnp.float32)
    w2 = init(ks[6], (embed_size, F))            # ff[2].weight
    b2 = jnp.zeros((embed_size,), jnp.float32)

    eye_h = jnp.eye(heads, dtype=jnp.float32)
    bf16 = jnp.bfloat16
    params = {
        # per-head Linear acts as x @ W.T ; block-diagonalize across heads.
        # Matmul operands are shipped in bf16 (MXU native); accumulation stays f32.
        "wv_bd": jnp.kron(eye_h, wv.T).astype(bf16),
        "wk_bd": jnp.kron(eye_h, wk.T).astype(bf16),
        "wq_bd": jnp.kron(eye_h, wq.T).astype(bf16),
        "wfc": wfc.T.astype(bf16),
        "bfc": bfc.reshape(1, -1),
        "g1": jnp.ones((1, embed_size), jnp.float32),
        "bt1": jnp.zeros((1, embed_size), jnp.float32),
        "g2": jnp.ones((1, embed_size), jnp.float32),
        "bt2": jnp.zeros((1, embed_size), jnp.float32),
        "w1": w1.T.astype(bf16),
        "b1": b1.reshape(1, -1),
        "w2": w2.T.astype(bf16),
        "b2": b2.reshape(1, -1),
    }
    # raw f32 copies for the pure-JAX reference check
    raw = {"wv": wv, "wk": wk, "wq": wq, "wfc": wfc, "bfc": bfc,
           "w1": w1, "b1": b1, "w2": w2, "b2": b2}
    return params, raw


def reference(v, k, q, mask, raw, *, heads, embed_size):
    # Pure-JAX f32 mirror of the PyTorch forward (eval-mode dropout == identity).
    N, S, E = q.shape
    D = E // heads

    def proj(x, w):  # per-head Linear(D, D, bias=False)
        xh = x.reshape(N, S, heads, D)
        return jnp.einsum("nshd,ed->nshe", xh, w)

    values = proj(k, raw["wv"])   # values <- k
    keys = proj(v, raw["wk"])     # keys   <- v
    queries = proj(q, raw["wq"])  # queries<- q
    energy = jnp.einsum("nqhd,nkhd->nhqk", queries, keys)
    energy = jnp.where(mask[:, None, :, :] == 0, -1e20, energy)
    attn = jax.nn.softmax(energy / (E ** 0.5), axis=3)
    out = jnp.einsum("nhqk,nkhd->nqhd", attn, values).reshape(N, S, E)
    out = out @ raw["wfc"].T + raw["bfc"]

    def ln(x):
        mu = x.mean(-1, keepdims=True)
        var = ((x - mu) ** 2).mean(-1, keepdims=True)
        return (x - mu) / jnp.sqrt(var + 1e-5)

    x = ln(out + q)
    ff = jnp.maximum(x @ raw["w1"].T + raw["b1"], 0.0) @ raw["w2"].T + raw["b2"]
    return ln(ff + x)


if __name__ == "__main__":
    N, S, E = 2, 8, 32
    heads, forward_exp, dropout = 4, 4, 0.0  # dropout is identity (eval mode)

    key = jax.random.PRNGKey(0)
    kv, kk, kq, kp = jax.random.split(key, 4)
    v = jax.random.normal(kv, (N, S, E), jnp.float32)
    k = jax.random.normal(kk, (N, S, E), jnp.float32)
    q = jax.random.normal(kq, (N, S, E), jnp.float32)
    # causal mask: 1 = keep, 0 = masked
    mask = jnp.broadcast_to(jnp.tril(jnp.ones((S, S), jnp.float32)), (N, S, S))

    params, raw = make_params(kp, E, heads, forward_exp)

    out = transformer_block(v, k, q, mask, params, heads=heads, forward_exp=forward_exp)
    out = jax.block_until_ready(out)

    ref = reference(v, k, q, mask, raw, heads=heads, embed_size=E)
    # bf16 inputs + bf16 matmul operands in the kernel vs full-f32 reference -> loosened tolerance.
    assert jnp.allclose(out, ref, atol=3e-2, rtol=3e-2), "mismatch vs pure-JAX reference"

    print("KERNEL_OK")
</pallas_src>

<mosaic_0001>
module attributes {stable_mosaic.version = 11 : i64} {
  func.func @transformer_block_kernel(%arg0: i32, %arg1: memref<1x8x32xbf16, #tpu.memory_space<vmem>>, %arg2: memref<1x8x32xbf16, #tpu.memory_space<vmem>>, %arg3: memref<1x8x32xbf16, #tpu.memory_space<vmem>>, %arg4: memref<1x8x8xbf16, #tpu.memory_space<vmem>>, %arg5: memref<32x32xbf16, #tpu.memory_space<vmem>>, %arg6: memref<32x32xbf16, #tpu.memory_space<vmem>>, %arg7: memref<32x32xbf16, #tpu.memory_space<vmem>>, %arg8: memref<32x32xbf16, #tpu.memory_space<vmem>>, %arg9: memref<1x32xf32, #tpu.memory_space<vmem>>, %arg10: memref<1x32xf32, #tpu.memory_space<vmem>>, %arg11: memref<1x32xf32, #tpu.memory_space<vmem>>, %arg12: memref<1x32xf32, #tpu.memory_space<vmem>>, %arg13: memref<1x32xf32, #tpu.memory_space<vmem>>, %arg14: memref<32x128xbf16, #tpu.memory_space<vmem>>, %arg15: memref<1x128xf32, #tpu.memory_space<vmem>>, %arg16: memref<128x32xbf16, #tpu.memory_space<vmem>>, %arg17: memref<1x32xf32, #tpu.memory_space<vmem>>, %arg18: memref<1x8x32xf32, #tpu.memory_space<vmem>>) attributes {dimension_semantics = [#tpu.dimension_semantics<parallel>], iteration_bounds = array<i64: 2>, scalar_prefetch = 0 : i64, scratch_operands = 0 : i64, tpu.core_type = #tpu.core_type<tc>, window_params = [{transform_indices = @transform_0, window_bounds = array<i64: 1, 8, 32>}, {transform_indices = @transform_1, window_bounds = array<i64: 1, 8, 32>}, {transform_indices = @transform_2, window_bounds = array<i64: 1, 8, 32>}, {transform_indices = @transform_3, window_bounds = array<i64: 1, 8, 8>}, {pipeline_mode = #tpu.pipeline_mode<synchronous>, transform_indices = @transform_4, window_bounds = array<i64: 32, 32>}, {pipeline_mode = #tpu.pipeline_mode<synchronous>, transform_indices = @transform_5, window_bounds = array<i64: 32, 32>}, {pipeline_mode = #tpu.pipeline_mode<synchronous>, transform_indices = @transform_6, window_bounds = array<i64: 32, 32>}, {pipeline_mode = #tpu.pipeline_mode<synchronous>, transform_indices = @transform_7, window_bounds = array<i64: 32, 32>}, {pipeline_mode = #tpu.pipeline_mode<synchronous>, transform_indices = @transform_8, window_bounds = array<i64: 1, 32>}, {pipeline_mode = #tpu.pipeline_mode<synchronous>, transform_indices = @transform_9, window_bounds = array<i64: 1, 32>}, {pipeline_mode = #tpu.pipeline_mode<synchronous>, transform_indices = @transform_10, window_bounds = array<i64: 1, 32>}, {pipeline_mode = #tpu.pipeline_mode<synchronous>, transform_indices = @transform_11, window_bounds = array<i64: 1, 32>}, {pipeline_mode = #tpu.pipeline_mode<synchronous>, transform_indices = @transform_12, window_bounds = array<i64: 1, 32>}, {pipeline_mode = #tpu.pipeline_mode<synchronous>, transform_indices = @transform_13, window_bounds = array<i64: 32, 128>}, {pipeline_mode = #tpu.pipeline_mode<synchronous>, transform_indices = @transform_14, window_bounds = array<i64: 1, 128>}, {pipeline_mode = #tpu.pipeline_mode<synchronous>, transform_indices = @transform_15, window_bounds = array<i64: 128, 32>}, {pipeline_mode = #tpu.pipeline_mode<synchronous>, transform_indices = @transform_16, window_bounds = array<i64: 1, 32>}, {transform_indices = @transform_17, window_bounds = array<i64: 1, 8, 32>}]} {
    %c0 = arith.constant 0 : index
    %c0_0 = arith.constant 0 : index
    %c0_1 = arith.constant 0 : index
    %0 = vector.load %arg1[%c0, %c0_0, %c0_1] : memref<1x8x32xbf16, #tpu.memory_space<vmem>>, vector<1x8x32xbf16>
    %1 = vector.shape_cast %0 : vector<1x8x32xbf16> to vector<8x32xbf16>
    %c0_2 = arith.constant 0 : index
    %c0_3 = arith.constant 0 : index
    %c0_4 = arith.constant 0 : index
    %2 = vector.load %arg2[%c0_2, %c0_3, %c0_4] : memref<1x8x32xbf16, #tpu.memory_space<vmem>>, vector<1x8x32xbf16>
    %3 = vector.shape_cast %2 : vector<1x8x32xbf16> to vector<8x32xbf16>
    %c0_5 = arith.constant 0 : index
    %c0_6 = arith.constant 0 : index
    %c0_7 = arith.constant 0 : index
    %4 = vector.load %arg3[%c0_5, %c0_6, %c0_7] : memref<1x8x32xbf16, #tpu.memory_space<vmem>>, vector<1x8x32xbf16>
    %5 = vector.shape_cast %4 : vector<1x8x32xbf16> to vector<8x32xbf16>
    %c0_8 = arith.constant 0 : index
    %c0_9 = arith.constant 0 : index
    %6 = vector.load %arg5[%c0_8, %c0_9] : memref<32x32xbf16, #tpu.memory_space<vmem>>, vector<32x32xbf16>
    %cst = arith.constant dense<0.000000e+00> : vector<8x32xf32>
    %7 = tpu.matmul %3, %6, %cst {dimension_numbers = #tpu.dot_dimension_numbers<[1], [0], [0], [1], [0, 0, 1, 1], [], []>} : vector<8x32xbf16>, vector<32x32xbf16>, vector<8x32xf32> -> vector<8x32xf32>
    %8 = arith.truncf %7 : vector<8x32xf32> to vector<8x32xbf16>
    %c0_10 = arith.constant 0 : index
    %c0_11 = arith.constant 0 : index
    %9 = vector.load %arg6[%c0_10, %c0_11] : memref<32x32xbf16, #tpu.memory_space<vmem>>, vector<32x32xbf16>
    %cst_12 = arith.constant dense<0.000000e+00> : vector<8x32xf32>
    %10 = tpu.matmul %1, %9, %cst_12 {dimension_numbers = #tpu.dot_dimension_numbers<[1], [0], [0], [1], [0, 0, 1, 1], [], []>} : vector<8x32xbf16>, vector<32x32xbf16>, vector<8x32xf32> -> vector<8x32xf32>
    %11 = arith.truncf %10 : vector<8x32xf32> to vector<8x32xbf16>
    %c0_13 = arith.constant 0 : index
    %c0_14 = arith.constant 0 : index
    %12 = vector.load %arg7[%c0_13, %c0_14] : memref<32x32xbf16, #tpu.memory_space<vmem>>, vector<32x32xbf16>
    %cst_15 = arith.constant dense<0.000000e+00> : vector<8x32xf32>
    %13 = tpu.matmul %5, %12, %cst_15 {dimension_numbers = #tpu.dot_dimension_numbers<[1], [0], [0], [1], [0, 0, 1, 1], [], []>} : vector<8x32xbf16>, vector<32x32xbf16>, vector<8x32xf32> -> vector<8x32xf32>
    %cst_16 = arith.constant 0.176776692 : f32
    %14 = vector.broadcast %cst_16 : f32 to vector<8x32xf32>
    %15 = arith.mulf %13, %14 : vector<8x32xf32>
    %16 = arith.truncf %15 : vector<8x32xf32> to vector<8x32xbf16>
    %17 = vector.shape_cast %16 : vector<8x32xbf16> to vector<1x8x32xbf16>
    %18 = vector.shape_cast %11 : vector<8x32xbf16> to vector<1x8x32xbf16>
    %19 = vector.shape_cast %8 : vector<8x32xbf16> to vector<1x8x32xbf16>
    %c0_17 = arith.constant 0 : index
    %c0_18 = arith.constant 0 : index
    %c0_19 = arith.constant 0 : index
    %20 = vector.load %arg4[%c0_17, %c0_18, %c0_19] : memref<1x8x8xbf16, #tpu.memory_space<vmem>>, vector<1x8x8xbf16>
    %21 = arith.extf %20 : vector<1x8x8xbf16> to vector<1x8x8xf32>
    %cst_20 = arith.constant 0.000000e+00 : f32
    %22 = vector.broadcast %cst_20 : f32 to vector<8x32xf32>
    %23 = vector.extract_strided_slice %17 {offsets = [0, 0, 0], sizes = [1, 8, 8], strides = [1, 1, 1]} : vector<1x8x32xbf16> to vector<1x8x8xbf16>
    %24 = vector.extract_strided_slice %18 {offsets = [0, 0, 0], sizes = [1, 8, 8], strides = [1, 1, 1]} : vector<1x8x32xbf16> to vector<1x8x8xbf16>
    %25 = vector.extract_strided_slice %19 {offsets = [0, 0, 0], sizes = [1, 8, 8], strides = [1, 1, 1]} : vector<1x8x32xbf16> to vector<1x8x8xbf16>
    "tpu.trace_start"() <{level = 10 : i32, message = "bqd,bkd->bqk"}> : () -> ()
    %cst_21 = arith.constant dense<0.000000e+00> : vector<1x8x8xf32>
    %26 = tpu.matmul %23, %24, %cst_21 {dimension_numbers = #tpu.dot_dimension_numbers<[2], [2], [1], [1], [0, 0, 0, 1, 1, 1], [0], [0]>} : vector<1x8x8xbf16>, vector<1x8x8xbf16>, vector<1x8x8xf32> -> vector<1x8x8xf32>
    "tpu.trace_stop"() : () -> ()
    %27 = arith.addf %26, %21 : vector<1x8x8xf32>
    %cst_22 = arith.constant dense<0xFF800000> : vector<1x8xf32>
    %28 = vector.multi_reduction <maximumf>, %27, %cst_22 [2] : vector<1x8x8xf32> to vector<1x8xf32>
    %29 = vector.shape_cast %28 : vector<1x8xf32> to vector<1x8x1xf32>
    %30 = vector.broadcast %29 : vector<1x8x1xf32> to vector<1x8x8xf32>
    %31 = arith.subf %27, %30 : vector<1x8x8xf32>
    %32 = math.exp %31 : vector<1x8x8xf32>
    %cst_23 = arith.constant dense<0.000000e+00> : vector<1x8xf32>
    %33 = vector.multi_reduction <add>, %32, %cst_23 [2] : vector<1x8x8xf32> to vector<1x8xf32>
    %34 = vector.shape_cast %33 : vector<1x8xf32> to vector<1x8x1xf32>
    %35 = tpu.reciprocal %34 {approx = true} : vector<1x8x1xf32> -> vector<1x8x1xf32>
    %36 = vector.broadcast %35 : vector<1x8x1xf32> to vector<1x8x8xf32>
    %37 = arith.mulf %32, %36 : vector<1x8x8xf32>
    %38 = arith.truncf %37 : vector<1x8x8xf32> to vector<1x8x8xbf16>
    "tpu.trace_start"() <{level = 10 : i32, message = "bqk,bkd->bqd"}> : () -> ()
    %cst_24 = arith.constant dense<0.000000e+00> : vector<1x8x8xf32>
    %39 = tpu.matmul %38, %25, %cst_24 {dimension_numbers = #tpu.dot_dimension_numbers<[2], [1], [1], [2], [0, 0, 0, 1, 1, 2], [0], [0]>} : vector<1x8x8xbf16>, vector<1x8x8xbf16>, vector<1x8x8xf32> -> vector<1x8x8xf32>
    "tpu.trace_stop"() : () -> ()
    %40 = vector.shape_cast %39 : vector<1x8x8xf32> to vector<8x8xf32>
    %41 = arith.truncf %40 : vector<8x8xf32> to vector<8x8xbf16>
    %c0_25 = arith.constant 0 : index
    %c0_26 = arith.constant 0 : index
    %42 = vector.load %arg8[%c0_25, %c0_26] : memref<32x32xbf16, #tpu.memory_space<vmem>>, vector<8x32xbf16>
    %cst_27 = arith.constant dense<0.000000e+00> : vector<8x32xf32>
    %43 = tpu.matmul %41, %42, %cst_27 {dimension_numbers = #tpu.dot_dimension_numbers<[1], [0], [0], [1], [0, 0, 1, 1], [], []>} : vector<8x8xbf16>, vector<8x32xbf16>, vector<8x32xf32> -> vector<8x32xf32>
    %44 = arith.addf %22, %43 : vector<8x32xf32>
    %45 = vector.extract_strided_slice %17 {offsets = [0, 0, 8], sizes = [1, 8, 8], strides = [1, 1, 1]} : vector<1x8x32xbf16> to vector<1x8x8xbf16>
    %46 = vector.extract_strided_slice %18 {offsets = [0, 0, 8], sizes = [1, 8, 8], strides = [1, 1, 1]} : vector<1x8x32xbf16> to vector<1x8x8xbf16>
    %47 = vector.extract_strided_slice %19 {offsets = [0, 0, 8], sizes = [1, 8, 8], strides = [1, 1, 1]} : vector<1x8x32xbf16> to vector<1x8x8xbf16>
    "tpu.trace_start"() <{level = 10 : i32, message = "bqd,bkd->bqk"}> : () -> ()
    %cst_28 = arith.constant dense<0.000000e+00> : vector<1x8x8xf32>
    %48 = tpu.matmul %45, %46, %cst_28 {dimension_numbers = #tpu.dot_dimension_numbers<[2], [2], [1], [1], [0, 0, 0, 1, 1, 1], [0], [0]>} : vector<1x8x8xbf16>, vector<1x8x8xbf16>, vector<1x8x8xf32> -> vector<1x8x8xf32>
    "tpu.trace_stop"() : () -> ()
    %49 = arith.addf %48, %21 : vector<1x8x8xf32>
    %cst_29 = arith.constant dense<0xFF800000> : vector<1x8xf32>
    %50 = vector.multi_reduction <maximumf>, %49, %cst_29 [2] : vector<1x8x8xf32> to vector<1x8xf32>
    %51 = vector.shape_cast %50 : vector<1x8xf32> to vector<1x8x1xf32>
    %52 = vector.broadcast %51 : vector<1x8x1xf32> to vector<1x8x8xf32>
    %53 = arith.subf %49, %52 : vector<1x8x8xf32>
    %54 = math.exp %53 : vector<1x8x8xf32>
    %cst_30 = arith.constant dense<0.000000e+00> : vector<1x8xf32>
    %55 = vector.multi_reduction <add>, %54, %cst_30 [2] : vector<1x8x8xf32> to vector<1x8xf32>
    %56 = vector.shape_cast %55 : vector<1x8xf32> to vector<1x8x1xf32>
    %57 = tpu.reciprocal %56 {approx = true} : vector<1x8x1xf32> -> vector<1x8x1xf32>
    %58 = vector.broadcast %57 : vector<1x8x1xf32> to vector<1x8x8xf32>
    %59 = arith.mulf %54, %58 : vector<1x8x8xf32>
    %60 = arith.truncf %59 : vector<1x8x8xf32> to vector<1x8x8xbf16>
    "tpu.trace_start"() <{level = 10 : i32, message = "bqk,bkd->bqd"}> : () -> ()
    %cst_31 = arith.constant dense<0.000000e+00> : vector<1x8x8xf32>
    %61 = tpu.matmul %60, %47, %cst_31 {dimension_numbers = #tpu.dot_dimension_numbers<[2], [1], [1], [2], [0, 0, 0, 1, 1, 2], [0], [0]>} : vector<1x8x8xbf16>, vector<1x8x8xbf16>, vector<1x8x8xf32> -> vector<1x8x8xf32>
    "tpu.trace_stop"() : () -> ()
    %62 = vector.shape_cast %61 : vector<1x8x8xf32> to vector<8x8xf32>
    %63 = arith.truncf %62 : vector<8x8xf32> to vector<8x8xbf16>
    %c8 = arith.constant 8 : index
    %c0_32 = arith.constant 0 : index
    %64 = vector.load %arg8[%c8, %c0_32] : memref<32x32xbf16, #tpu.memory_space<vmem>>, vector<8x32xbf16>
    %cst_33 = arith.constant dense<0.000000e+00> : vector<8x32xf32>
    %65 = tpu.matmul %63, %64, %cst_33 {dimension_numbers = #tpu.dot_dimension_numbers<[1], [0], [0], [1], [0, 0, 1, 1], [], []>} : vector<8x8xbf16>, vector<8x32xbf16>, vector<8x32xf32> -> vector<8x32xf32>
    %66 = arith.addf %44, %65 : vector<8x32xf32>
    %67 = vector.extract_strided_slice %17 {offsets = [0, 0, 16], sizes = [1, 8, 8], strides = [1, 1, 1]} : vector<1x8x32xbf16> to vector<1x8x8xbf16>
    %68 = vector.extract_strided_slice %18 {offsets = [0, 0, 16], sizes = [1, 8, 8], strides = [1, 1, 1]} : vector<1x8x32xbf16> to vector<1x8x8xbf16>
    %69 = vector.extract_strided_slice %19 {offsets = [0, 0, 16], sizes = [1, 8, 8], strides = [1, 1, 1]} : vector<1x8x32xbf16> to vector<1x8x8xbf16>
    "tpu.trace_start"() <{level = 10 : i32, message = "bqd,bkd->bqk"}> : () -> ()
    %cst_34 = arith.constant dense<0.000000e+00> : vector<1x8x8xf32>
    %70 = tpu.matmul %67, %68, %cst_34 {dimension_numbers = #tpu.dot_dimension_numbers<[2], [2], [1], [1], [0, 0, 0, 1, 1, 1], [0], [0]>} : vector<1x8x8xbf16>, vector<1x8x8xbf16>, vector<1x8x8xf32> -> vector<1x8x8xf32>
    "tpu.trace_stop"() : () -> ()
    %71 = arith.addf %70, %21 : vector<1x8x8xf32>
    %cst_35 = arith.constant dense<0xFF800000> : vector<1x8xf32>
    %72 = vector.multi_reduction <maximumf>, %71, %cst_35 [2] : vector<1x8x8xf32> to vector<1x8xf32>
    %73 = vector.shape_cast %72 : vector<1x8xf32> to vector<1x8x1xf32>
    %74 = vector.broadcast %73 : vector<1x8x1xf32> to vector<1x8x8xf32>
    %75 = arith.subf %71, %74 : vector<1x8x8xf32>
    %76 = math.exp %75 : vector<1x8x8xf32>
    %cst_36 = arith.constant dense<0.000000e+00> : vector<1x8xf32>
    %77 = vector.multi_reduction <add>, %76, %cst_36 [2] : vector<1x8x8xf32> to vector<1x8xf32>
    %78 = vector.shape_cast %77 : vector<1x8xf32> to vector<1x8x1xf32>
    %79 = tpu.reciprocal %78 {approx = true} : vector<1x8x1xf32> -> vector<1x8x1xf32>
    %80 = vector.broadcast %79 : vector<1x8x1xf32> to vector<1x8x8xf32>
    %81 = arith.mulf %76, %80 : vector<1x8x8xf32>
    %82 = arith.truncf %81 : vector<1x8x8xf32> to vector<1x8x8xbf16>
    "tpu.trace_start"() <{level = 10 : i32, message = "bqk,bkd->bqd"}> : () -> ()
    %cst_37 = arith.constant dense<0.000000e+00> : vector<1x8x8xf32>
    %83 = tpu.matmul %82, %69, %cst_37 {dimension_numbers = #tpu.dot_dimension_numbers<[2], [1], [1], [2], [0, 0, 0, 1, 1, 2], [0], [0]>} : vector<1x8x8xbf16>, vector<1x8x8xbf16>, vector<1x8x8xf32> -> vector<1x8x8xf32>
    "tpu.trace_stop"() : () -> ()
    %84 = vector.shape_cast %83 : vector<1x8x8xf32> to vector<8x8xf32>
    %85 = arith.truncf %84 : vector<8x8xf32> to vector<8x8xbf16>
    %c16 = arith.constant 16 : index
    %c0_38 = arith.constant 0 : index
    %86 = vector.load %arg8[%c16, %c0_38] : memref<32x32xbf16, #tpu.memory_space<vmem>>, vector<8x32xbf16>
    %cst_39 = arith.constant dense<0.000000e+00> : vector<8x32xf32>
    %87 = tpu.matmul %85, %86, %cst_39 {dimension_numbers = #tpu.dot_dimension_numbers<[1], [0], [0], [1], [0, 0, 1, 1], [], []>} : vector<8x8xbf16>, vector<8x32xbf16>, vector<8x32xf32> -> vector<8x32xf32>
    %88 = arith.addf %66, %87 : vector<8x32xf32>
    %89 = vector.extract_strided_slice %17 {offsets = [0, 0, 24], sizes = [1, 8, 8], strides = [1, 1, 1]} : vector<1x8x32xbf16> to vector<1x8x8xbf16>
    %90 = vector.extract_strided_slice %18 {offsets = [0, 0, 24], sizes = [1, 8, 8], strides = [1, 1, 1]} : vector<1x8x32xbf16> to vector<1x8x8xbf16>
    %91 = vector.extract_strided_slice %19 {offsets = [0, 0, 24], sizes = [1, 8, 8], strides = [1, 1, 1]} : vector<1x8x32xbf16> to vector<1x8x8xbf16>
    "tpu.trace_start"() <{level = 10 : i32, message = "bqd,bkd->bqk"}> : () -> ()
    %cst_40 = arith.constant dense<0.000000e+00> : vector<1x8x8xf32>
    %92 = tpu.matmul %89, %90, %cst_40 {dimension_numbers = #tpu.dot_dimension_numbers<[2], [2], [1], [1], [0, 0, 0, 1, 1, 1], [0], [0]>} : vector<1x8x8xbf16>, vector<1x8x8xbf16>, vector<1x8x8xf32> -> vector<1x8x8xf32>
    "tpu.trace_stop"() : () -> ()
    %93 = arith.addf %92, %21 : vector<1x8x8xf32>
    %cst_41 = arith.constant dense<0xFF800000> : vector<1x8xf32>
    %94 = vector.multi_reduction <maximumf>, %93, %cst_41 [2] : vector<1x8x8xf32> to vector<1x8xf32>
    %95 = vector.shape_cast %94 : vector<1x8xf32> to vector<1x8x1xf32>
    %96 = vector.broadcast %95 : vector<1x8x1xf32> to vector<1x8x8xf32>
    %97 = arith.subf %93, %96 : vector<1x8x8xf32>
    %98 = math.exp %97 : vector<1x8x8xf32>
    %cst_42 = arith.constant dense<0.000000e+00> : vector<1x8xf32>
    %99 = vector.multi_reduction <add>, %98, %cst_42 [2] : vector<1x8x8xf32> to vector<1x8xf32>
    %100 = vector.shape_cast %99 : vector<1x8xf32> to vector<1x8x1xf32>
    %101 = tpu.reciprocal %100 {approx = true} : vector<1x8x1xf32> -> vector<1x8x1xf32>
    %102 = vector.broadcast %101 : vector<1x8x1xf32> to vector<1x8x8xf32>
    %103 = arith.mulf %98, %102 : vector<1x8x8xf32>
    %104 = arith.truncf %103 : vector<1x8x8xf32> to vector<1x8x8xbf16>
    "tpu.trace_start"() <{level = 10 : i32, message = "bqk,bkd->bqd"}> : () -> ()
    %cst_43 = arith.constant dense<0.000000e+00> : vector<1x8x8xf32>
    %105 = tpu.matmul %104, %91, %cst_43 {dimension_numbers = #tpu.dot_dimension_numbers<[2], [1], [1], [2], [0, 0, 0, 1, 1, 2], [0], [0]>} : vector<1x8x8xbf16>, vector<1x8x8xbf16>, vector<1x8x8xf32> -> vector<1x8x8xf32>
    "tpu.trace_stop"() : () -> ()
    %106 = vector.shape_cast %105 : vector<1x8x8xf32> to vector<8x8xf32>
    %107 = arith.truncf %106 : vector<8x8xf32> to vector<8x8xbf16>
    %c24 = arith.constant 24 : index
    %c0_44 = arith.constant 0 : index
    %108 = vector.load %arg8[%c24, %c0_44] : memref<32x32xbf16, #tpu.memory_space<vmem>>, vector<8x32xbf16>
    %cst_45 = arith.constant dense<0.000000e+00> : vector<8x32xf32>
    %109 = tpu.matmul %107, %108, %cst_45 {dimension_numbers = #tpu.dot_dimension_numbers<[1], [0], [0], [1], [0, 0, 1, 1], [], []>} : vector<8x8xbf16>, vector<8x32xbf16>, vector<8x32xf32> -> vector<8x32xf32>
    %110 = arith.addf %88, %109 : vector<8x32xf32>
    %c0_46 = arith.constant 0 : index
    %c0_47 = arith.constant 0 : index
    %111 = vector.load %arg9[%c0_46, %c0_47] : memref<1x32xf32, #tpu.memory_space<vmem>>, vector<1x32xf32>
    %112 = vector.broadcast %111 : vector<1x32xf32> to vector<8x32xf32>
    %113 = arith.addf %110, %112 : vector<8x32xf32>
    %114 = arith.extf %5 : vector<8x32xbf16> to vector<8x32xf32>
    %115 = arith.addf %113, %114 : vector<8x32xf32>
    %cst_48 = arith.constant dense<0.000000e+00> : vector<8xf32>
    %116 = vector.multi_reduction <add>, %115, %cst_48 [1] : vector<8x32xf32> to vector<8xf32>
    %117 = vector.shape_cast %116 : vector<8xf32> to vector<8x1xf32>
    %cst_49 = arith.constant 3.200000e+01 : f32
    %118 = vector.broadcast %cst_49 : f32 to vector<8x1xf32>
    %119 = arith.divf %117, %118 : vector<8x1xf32>
    %120 = vector.broadcast %119 : vector<8x1xf32> to vector<8x32xf32>
    %121 = arith.subf %115, %120 : vector<8x32xf32>
    %122 = arith.mulf %121, %121 : vector<8x32xf32>
    %cst_50 = arith.constant dense<0.000000e+00> : vector<8xf32>
    %123 = vector.multi_reduction <add>, %122, %cst_50 [1] : vector<8x32xf32> to vector<8xf32>
    %124 = vector.shape_cast %123 : vector<8xf32> to vector<8x1xf32>
    %cst_51 = arith.constant 3.200000e+01 : f32
    %125 = vector.broadcast %cst_51 : f32 to vector<8x1xf32>
    %126 = arith.divf %124, %125 : vector<8x1xf32>
    %127 = vector.broadcast %119 : vector<8x1xf32> to vector<8x32xf32>
    %128 = arith.subf %115, %127 : vector<8x32xf32>
    %cst_52 = arith.constant 9.99999974E-6 : f32
    %129 = vector.broadcast %cst_52 : f32 to vector<8x1xf32>
    %130 = arith.addf %126, %129 : vector<8x1xf32>
    %131 = math.rsqrt %130 : vector<8x1xf32>
    %132 = vector.broadcast %131 : vector<8x1xf32> to vector<8x32xf32>
    %133 = arith.mulf %128, %132 : vector<8x32xf32>
    %c0_53 = arith.constant 0 : index
    %c0_54 = arith.constant 0 : index
    %134 = vector.load %arg10[%c0_53, %c0_54] : memref<1x32xf32, #tpu.memory_space<vmem>>, vector<1x32xf32>
    %135 = vector.broadcast %134 : vector<1x32xf32> to vector<8x32xf32>
    %136 = arith.mulf %133, %135 : vector<8x32xf32>
    %c0_55 = arith.constant 0 : index
    %c0_56 = arith.constant 0 : index
    %137 = vector.load %arg11[%c0_55, %c0_56] : memref<1x32xf32, #tpu.memory_space<vmem>>, vector<1x32xf32>
    %138 = vector.broadcast %137 : vector<1x32xf32> to vector<8x32xf32>
    %139 = arith.addf %136, %138 : vector<8x32xf32>
    %140 = arith.truncf %139 : vector<8x32xf32> to vector<8x32xbf16>
    %c0_57 = arith.constant 0 : index
    %c0_58 = arith.constant 0 : index
    %141 = vector.load %arg14[%c0_57, %c0_58] : memref<32x128xbf16, #tpu.memory_space<vmem>>, vector<32x128xbf16>
    %cst_59 = arith.constant dense<0.000000e+00> : vector<8x128xf32>
    %142 = tpu.matmul %140, %141, %cst_59 {dimension_numbers = #tpu.dot_dimension_numbers<[1], [0], [0], [1], [0, 0, 1, 1], [], []>} : vector<8x32xbf16>, vector<32x128xbf16>, vector<8x128xf32> -> vector<8x128xf32>
    %c0_60 = arith.constant 0 : index
    %c0_61 = arith.constant 0 : index
    %143 = vector.load %arg15[%c0_60, %c0_61] : memref<1x128xf32, #tpu.memory_space<vmem>>, vector<1x128xf32>
    %144 = vector.broadcast %143 : vector<1x128xf32> to vector<8x128xf32>
    %145 = arith.addf %142, %144 : vector<8x128xf32>
    %cst_62 = arith.constant 0.000000e+00 : f32
    %146 = vector.broadcast %cst_62 : f32 to vector<8x128xf32>
    %147 = arith.maximumf %145, %146 : vector<8x128xf32>
    %148 = arith.truncf %147 : vector<8x128xf32> to vector<8x128xbf16>
    %c0_63 = arith.constant 0 : index
    %c0_64 = arith.constant 0 : index
    %149 = vector.load %arg16[%c0_63, %c0_64] : memref<128x32xbf16, #tpu.memory_space<vmem>>, vector<128x32xbf16>
    %cst_65 = arith.constant dense<0.000000e+00> : vector<8x32xf32>
    %150 = tpu.matmul %148, %149, %cst_65 {dimension_numbers = #tpu.dot_dimension_numbers<[1], [0], [0], [1], [0, 0, 1, 1], [], []>} : vector<8x128xbf16>, vector<128x32xbf16>, vector<8x32xf32> -> vector<8x32xf32>
    %c0_66 = arith.constant 0 : index
    %c0_67 = arith.constant 0 : index
    %151 = vector.load %arg17[%c0_66, %c0_67] : memref<1x32xf32, #tpu.memory_space<vmem>>, vector<1x32xf32>
    %152 = vector.broadcast %151 : vector<1x32xf32> to vector<8x32xf32>
    %153 = arith.addf %150, %152 : vector<8x32xf32>
    %154 = arith.addf %153, %139 : vector<8x32xf32>
    %cst_68 = arith.constant dense<0.000000e+00> : vector<8xf32>
    %155 = vector.multi_reduction <add>, %154, %cst_68 [1] : vector<8x32xf32> to vector<8xf32>
    %156 = vector.shape_cast %155 : vector<8xf32> to vector<8x1xf32>
    %cst_69 = arith.constant 3.200000e+01 : f32
    %157 = vector.broadcast %cst_69 : f32 to vector<8x1xf32>
    %158 = arith.divf %156, %157 : vector<8x1xf32>
    %159 = vector.broadcast %158 : vector<8x1xf32> to vector<8x32xf32>
    %160 = arith.subf %154, %159 : vector<8x32xf32>
    %161 = arith.mulf %160, %160 : vector<8x32xf32>
    %cst_70 = arith.constant dense<0.000000e+00> : vector<8xf32>
    %162 = vector.multi_reduction <add>, %161, %cst_70 [1] : vector<8x32xf32> to vector<8xf32>
    %163 = vector.shape_cast %162 : vector<8xf32> to vector<8x1xf32>
    %cst_71 = arith.constant 3.200000e+01 : f32
    %164 = vector.broadcast %cst_71 : f32 to vector<8x1xf32>
    %165 = arith.divf %163, %164 : vector<8x1xf32>
    %166 = vector.broadcast %158 : vector<8x1xf32> to vector<8x32xf32>
    %167 = arith.subf %154, %166 : vector<8x32xf32>
    %cst_72 = arith.constant 9.99999974E-6 : f32
    %168 = vector.broadcast %cst_72 : f32 to vector<8x1xf32>
    %169 = arith.addf %165, %168 : vector<8x1xf32>
    %170 = math.rsqrt %169 : vector<8x1xf32>
    %171 = vector.broadcast %170 : vector<8x1xf32> to vector<8x32xf32>
    %172 = arith.mulf %167, %171 : vector<8x32xf32>
    %c0_73 = arith.constant 0 : index
    %c0_74 = arith.constant 0 : index
    %173 = vector.load %arg12[%c0_73, %c0_74] : memref<1x32xf32, #tpu.memory_space<vmem>>, vector<1x32xf32>
    %174 = vector.broadcast %173 : vector<1x32xf32> to vector<8x32xf32>
    %175 = arith.mulf %172, %174 : vector<8x32xf32>
    %c0_75 = arith.constant 0 : index
    %c0_76 = arith.constant 0 : index
    %176 = vector.load %arg13[%c0_75, %c0_76] : memref<1x32xf32, #tpu.memory_space<vmem>>, vector<1x32xf32>
    %177 = vector.broadcast %176 : vector<1x32xf32> to vector<8x32xf32>
    %178 = arith.addf %175, %177 : vector<8x32xf32>
    %179 = vector.shape_cast %178 : vector<8x32xf32> to vector<1x8x32xf32>
    %c0_77 = arith.constant 0 : index
    %c0_78 = arith.constant 0 : index
    %c0_79 = arith.constant 0 : index
    %180 = vector.load %arg18[%c0_77, %c0_78, %c0_79] : memref<1x8x32xf32, #tpu.memory_space<vmem>>, vector<1x8x32xf32>
    tpu.vector_store %arg18[%c0_77, %c0_78, %c0_79], %179 {strides = array<i32>} : memref<1x8x32xf32, #tpu.memory_space<vmem>>, vector<1x8x32xf32>,
    return
  }
  func.func @transform_0(%arg0: i32) -> (i32, i32, i32) {
    %c0_i32 = arith.constant 0 : i32
    %c0_i32_0 = arith.constant 0 : i32
    %c0_i32_1 = arith.constant 0 : i32
    return %arg0, %c0_i32, %c0_i32_0 : i32, i32, i32
  }
  func.func @transform_1(%arg0: i32) -> (i32, i32, i32) {
    %c0_i32 = arith.constant 0 : i32
    %c0_i32_0 = arith.constant 0 : i32
    %c0_i32_1 = arith.constant 0 : i32
    return %arg0, %c0_i32, %c0_i32_0 : i32, i32, i32
  }
  func.func @transform_2(%arg0: i32) -> (i32, i32, i32) {
    %c0_i32 = arith.constant 0 : i32
    %c0_i32_0 = arith.constant 0 : i32
    %c0_i32_1 = arith.constant 0 : i32
    return %arg0, %c0_i32, %c0_i32_0 : i32, i32, i32
  }
  func.func @transform_3(%arg0: i32) -> (i32, i32, i32) {
    %c0_i32 = arith.constant 0 : i32
    %c0_i32_0 = arith.constant 0 : i32
    %c0_i32_1 = arith.constant 0 : i32
    return %arg0, %c0_i32, %c0_i32_0 : i32, i32, i32
  }
  func.func @transform_4(%arg0: i32) -> (i32, i32) {
    %c0_i32 = arith.constant 0 : i32
    %c0_i32_0 = arith.constant 0 : i32
    %c0_i32_1 = arith.constant 0 : i32
    return %c0_i32, %c0_i32_0 : i32, i32
  }
  func.func @transform_5(%arg0: i32) -> (i32, i32) {
    %c0_i32 = arith.constant 0 : i32
    %c0_i32_0 = arith.constant 0 : i32
    %c0_i32_1 = arith.constant 0 : i32
    return %c0_i32, %c0_i32_0 : i32, i32
  }
  func.func @transform_6(%arg0: i32) -> (i32, i32) {
    %c0_i32 = arith.constant 0 : i32
    %c0_i32_0 = arith.constant 0 : i32
    %c0_i32_1 = arith.constant 0 : i32
    return %c0_i32, %c0_i32_0 : i32, i32
  }
  func.func @transform_7(%arg0: i32) -> (i32, i32) {
    %c0_i32 = arith.constant 0 : i32
    %c0_i32_0 = arith.constant 0 : i32
    %c0_i32_1 = arith.constant 0 : i32
    return %c0_i32, %c0_i32_0 : i32, i32
  }
  func.func @transform_8(%arg0: i32) -> (i32, i32) {
    %c0_i32 = arith.constant 0 : i32
    %c0_i32_0 = arith.constant 0 : i32
    %c0_i32_1 = arith.constant 0 : i32
    return %c0_i32, %c0_i32_0 : i32, i32
  }
  func.func @transform_9(%arg0: i32) -> (i32, i32) {
    %c0_i32 = arith.constant 0 : i32
    %c0_i32_0 = arith.constant 0 : i32
    %c0_i32_1 = arith.constant 0 : i32
    return %c0_i32, %c0_i32_0 : i32, i32
  }
  func.func @transform_10(%arg0: i32) -> (i32, i32) {
    %c0_i32 = arith.constant 0 : i32
    %c0_i32_0 = arith.constant 0 : i32
    %c0_i32_1 = arith.constant 0 : i32
    return %c0_i32, %c0_i32_0 : i32, i32
  }
  func.func @transform_11(%arg0: i32) -> (i32, i32) {
    %c0_i32 = arith.constant 0 : i32
    %c0_i32_0 = arith.constant 0 : i32
    %c0_i32_1 = arith.constant 0 : i32
    return %c0_i32, %c0_i32_0 : i32, i32
  }
  func.func @transform_12(%arg0: i32) -> (i32, i32) {
    %c0_i32 = arith.constant 0 : i32
    %c0_i32_0 = arith.constant 0 : i32
    %c0_i32_1 = arith.constant 0 : i32
    return %c0_i32, %c0_i32_0 : i32, i32
  }
  func.func @transform_13(%arg0: i32) -> (i32, i32) {
    %c0_i32 = arith.constant 0 : i32
    %c0_i32_0 = arith.constant 0 : i32
    %c0_i32_1 = arith.constant 0 : i32
    return %c0_i32, %c0_i32_0 : i32, i32
  }
  func.func @transform_14(%arg0: i32) -> (i32, i32) {
    %c0_i32 = arith.constant 0 : i32
    %c0_i32_0 = arith.constant 0 : i32
    %c0_i32_1 = arith.constant 0 : i32
    return %c0_i32, %c0_i32_0 : i32, i32
  }
  func.func @transform_15(%arg0: i32) -> (i32, i32) {
    %c0_i32 = arith.constant 0 : i32
    %c0_i32_0 = arith.constant 0 : i32
    %c0_i32_1 = arith.constant 0 : i32
    return %c0_i32, %c0_i32_0 : i32, i32
  }
  func.func @transform_16(%arg0: i32) -> (i32, i32) {
    %c0_i32 = arith.constant 0 : i32
    %c0_i32_0 = arith.constant 0 : i32
    %c0_i32_1 = arith.constant 0 : i32
    return %c0_i32, %c0_i32_0 : i32, i32
  }
  func.func @transform_17(%arg0: i32) -> (i32, i32, i32) {
    %c0_i32 = arith.constant 0 : i32
    %c0_i32_0 = arith.constant 0 : i32
    %c0_i32_1 = arith.constant 0 : i32
    return %arg0, %c0_i32, %c0_i32_0 : i32, i32, i32
  }
}

module attributes {stable_mosaic.version = 11 : i64} {
  func.func @transformer_block_kernel(%arg0: i32, %arg1: memref<1x8x32xbf16, #tpu.memory_space<vmem>>, %arg2: memref<1x8x32xbf16, #tpu.memory_space<vmem>>, %arg3: memref<1x8x32xbf16, #tpu.memory_space<vmem>>, %arg4: memref<1x8x8xbf16, #tpu.memory_space<vmem>>, %arg5: memref<32x32xbf16, #tpu.memory_space<vmem>>, %arg6: memref<32x32xbf16, #tpu.memory_space<vmem>>, %arg7: memref<32x32xbf16, #tpu.memory_space<vmem>>, %arg8: memref<32x32xbf16, #tpu.memory_space<vmem>>, %arg9: memref<1x32xf32, #tpu.memory_space<vmem>>, %arg10: memref<1x32xf32, #tpu.memory_space<vmem>>, %arg11: memref<1x32xf32, #tpu.memory_space<vmem>>, %arg12: memref<1x32xf32, #tpu.memory_space<vmem>>, %arg13: memref<1x32xf32, #tpu.memory_space<vmem>>, %arg14: memref<32x128xbf16, #tpu.memory_space<vmem>>, %arg15: memref<1x128xf32, #tpu.memory_space<vmem>>, %arg16: memref<128x32xbf16, #tpu.memory_space<vmem>>, %arg17: memref<1x32xf32, #tpu.memory_space<vmem>>, %arg18: memref<1x8x32xf32, #tpu.memory_space<vmem>>) attributes {dimension_semantics = [#tpu.dimension_semantics<parallel>], iteration_bounds = array<i64: 2>, scalar_prefetch = 0 : i64, scratch_operands = 0 : i64, tpu.core_type = #tpu.core_type<tc>, window_params = [{transform_indices = @transform_0, window_bounds = array<i64: 1, 8, 32>}, {transform_indices = @transform_1, window_bounds = array<i64: 1, 8, 32>}, {transform_indices = @transform_2, window_bounds = array<i64: 1, 8, 32>}, {transform_indices = @transform_3, window_bounds = array<i64: 1, 8, 8>}, {pipeline_mode = #tpu.pipeline_mode<synchronous>, transform_indices = @transform_4, window_bounds = array<i64: 32, 32>}, {pipeline_mode = #tpu.pipeline_mode<synchronous>, transform_indices = @transform_5, window_bounds = array<i64: 32, 32>}, {pipeline_mode = #tpu.pipeline_mode<synchronous>, transform_indices = @transform_6, window_bounds = array<i64: 32, 32>}, {pipeline_mode = #tpu.pipeline_mode<synchronous>, transform_indices = @transform_7, window_bounds = array<i64: 32, 32>}, {pipeline_mode = #tpu.pipeline_mode<synchronous>, transform_indices = @transform_8, window_bounds = array<i64: 1, 32>}, {pipeline_mode = #tpu.pipeline_mode<synchronous>, transform_indices = @transform_9, window_bounds = array<i64: 1, 32>}, {pipeline_mode = #tpu.pipeline_mode<synchronous>, transform_indices = @transform_10, window_bounds = array<i64: 1, 32>}, {pipeline_mode = #tpu.pipeline_mode<synchronous>, transform_indices = @transform_11, window_bounds = array<i64: 1, 32>}, {pipeline_mode = #tpu.pipeline_mode<synchronous>, transform_indices = @transform_12, window_bounds = array<i64: 1, 32>}, {pipeline_mode = #tpu.pipeline_mode<synchronous>, transform_indices = @transform_13, window_bounds = array<i64: 32, 128>}, {pipeline_mode = #tpu.pipeline_mode<synchronous>, transform_indices = @transform_14, window_bounds = array<i64: 1, 128>}, {pipeline_mode = #tpu.pipeline_mode<synchronous>, transform_indices = @transform_15, window_bounds = array<i64: 128, 32>}, {pipeline_mode = #tpu.pipeline_mode<synchronous>, transform_indices = @transform_16, window_bounds = array<i64: 1, 32>}, {transform_indices = @transform_17, window_bounds = array<i64: 1, 8, 32>}]} {
    %c0 = arith.constant 0 : index
    %c0_0 = arith.constant 0 : index
    %c0_1 = arith.constant 0 : index
    %0 = vector.load %arg1[%c0, %c0_0, %c0_1] : memref<1x8x32xbf16, #tpu.memory_space<vmem>>, vector<1x8x32xbf16>
    %1 = vector.shape_cast %0 : vector<1x8x32xbf16> to vector<8x32xbf16>
    %c0_2 = arith.constant 0 : index
    %c0_3 = arith.constant 0 : index
    %c0_4 = arith.constant 0 : index
    %2 = vector.load %arg2[%c0_2, %c0_3, %c0_4] : memref<1x8x32xbf16, #tpu.memory_space<vmem>>, vector<1x8x32xbf16>
    %3 = vector.shape_cast %2 : vector<1x8x32xbf16> to vector<8x32xbf16>
    %c0_5 = arith.constant 0 : index
    %c0_6 = arith.constant 0 : index
    %c0_7 = arith.constant 0 : index
    %4 = vector.load %arg3[%c0_5, %c0_6, %c0_7] : memref<1x8x32xbf16, #tpu.memory_space<vmem>>, vector<1x8x32xbf16>
    %5 = vector.shape_cast %4 : vector<1x8x32xbf16> to vector<8x32xbf16>
    %c0_8 = arith.constant 0 : index
    %c0_9 = arith.constant 0 : index
    %6 = vector.load %arg5[%c0_8, %c0_9] : memref<32x32xbf16, #tpu.memory_space<vmem>>, vector<32x32xbf16>
    %cst = arith.constant dense<0.000000e+00> : vector<8x32xf32>
    %7 = tpu.matmul %3, %6, %cst {dimension_numbers = #tpu.dot_dimension_numbers<[1], [0], [0], [1], [0, 0, 1, 1], [], []>} : vector<8x32xbf16>, vector<32x32xbf16>, vector<8x32xf32> -> vector<8x32xf32>
    %8 = arith.truncf %7 : vector<8x32xf32> to vector<8x32xbf16>
    %c0_10 = arith.constant 0 : index
    %c0_11 = arith.constant 0 : index
    %9 = vector.load %arg6[%c0_10, %c0_11] : memref<32x32xbf16, #tpu.memory_space<vmem>>, vector<32x32xbf16>
    %cst_12 = arith.constant dense<0.000000e+00> : vector<8x32xf32>
    %10 = tpu.matmul %1, %9, %cst_12 {dimension_numbers = #tpu.dot_dimension_numbers<[1], [0], [0], [1], [0, 0, 1, 1], [], []>} : vector<8x32xbf16>, vector<32x32xbf16>, vector<8x32xf32> -> vector<8x32xf32>
    %11 = arith.truncf %10 : vector<8x32xf32> to vector<8x32xbf16>
    %c0_13 = arith.constant 0 : index
    %c0_14 = arith.constant 0 : index
    %12 = vector.load %arg7[%c0_13, %c0_14] : memref<32x32xbf16, #tpu.memory_space<vmem>>, vector<32x32xbf16>
    %cst_15 = arith.constant dense<0.000000e+00> : vector<8x32xf32>
    %13 = tpu.matmul %5, %12, %cst_15 {dimension_numbers = #tpu.dot_dimension_numbers<[1], [0], [0], [1], [0, 0, 1, 1], [], []>} : vector<8x32xbf16>, vector<32x32xbf16>, vector<8x32xf32> -> vector<8x32xf32>
    %cst_16 = arith.constant 0.176776692 : f32
    %14 = vector.broadcast %cst_16 : f32 to vector<8x32xf32>
    %15 = arith.mulf %13, %14 : vector<8x32xf32>
    %16 = arith.truncf %15 : vector<8x32xf32> to vector<8x32xbf16>
    %17 = vector.shape_cast %16 : vector<8x32xbf16> to vector<1x8x32xbf16>
    %18 = vector.shape_cast %11 : vector<8x32xbf16> to vector<1x8x32xbf16>
    %19 = vector.shape_cast %8 : vector<8x32xbf16> to vector<1x8x32xbf16>
    %c0_17 = arith.constant 0 : index
    %c0_18 = arith.constant 0 : index
    %c0_19 = arith.constant 0 : index
    %20 = vector.load %arg4[%c0_17, %c0_18, %c0_19] : memref<1x8x8xbf16, #tpu.memory_space<vmem>>, vector<1x8x8xbf16>
    %21 = arith.extf %20 : vector<1x8x8xbf16> to vector<1x8x8xf32>
    %cst_20 = arith.constant 0.000000e+00 : f32
    %22 = vector.broadcast %cst_20 : f32 to vector<8x32xf32>
    %23 = vector.extract_strided_slice %17 {offsets = [0, 0, 0], sizes = [1, 8, 8], strides = [1, 1, 1]} : vector<1x8x32xbf16> to vector<1x8x8xbf16>
    %24 = vector.extract_strided_slice %18 {offsets = [0, 0, 0], sizes = [1, 8, 8], strides = [1, 1, 1]} : vector<1x8x32xbf16> to vector<1x8x8xbf16>
    %25 = vector.extract_strided_slice %19 {offsets = [0, 0, 0], sizes = [1, 8, 8], strides = [1, 1, 1]} : vector<1x8x32xbf16> to vector<1x8x8xbf16>
    "tpu.trace_start"() <{level = 10 : i32, message = "bqd,bkd->bqk"}> : () -> ()
    %cst_21 = arith.constant dense<0.000000e+00> : vector<1x8x8xf32>
    %26 = tpu.matmul %23, %24, %cst_21 {dimension_numbers = #tpu.dot_dimension_numbers<[2], [2], [1], [1], [0, 0, 0, 1, 1, 1], [0], [0]>} : vector<1x8x8xbf16>, vector<1x8x8xbf16>, vector<1x8x8xf32> -> vector<1x8x8xf32>
    "tpu.trace_stop"() : () -> ()
    %27 = arith.addf %26, %21 : vector<1x8x8xf32>
    %cst_22 = arith.constant dense<0xFF800000> : vector<1x8xf32>
    %28 = vector.multi_reduction <maximumf>, %27, %cst_22 [2] : vector<1x8x8xf32> to vector<1x8xf32>
    %29 = vector.shape_cast %28 : vector<1x8xf32> to vector<1x8x1xf32>
    %30 = vector.broadcast %29 : vector<1x8x1xf32> to vector<1x8x8xf32>
    %31 = arith.subf %27, %30 : vector<1x8x8xf32>
    %32 = math.exp %31 : vector<1x8x8xf32>
    %cst_23 = arith.constant dense<0.000000e+00> : vector<1x8xf32>
    %33 = vector.multi_reduction <add>, %32, %cst_23 [2] : vector<1x8x8xf32> to vector<1x8xf32>
    %34 = vector.shape_cast %33 : vector<1x8xf32> to vector<1x8x1xf32>
    %35 = tpu.reciprocal %34 {approx = true} : vector<1x8x1xf32> -> vector<1x8x1xf32>
    %36 = vector.broadcast %35 : vector<1x8x1xf32> to vector<1x8x8xf32>
    %37 = arith.mulf %32, %36 : vector<1x8x8xf32>
    %38 = arith.truncf %37 : vector<1x8x8xf32> to vector<1x8x8xbf16>
    "tpu.trace_start"() <{level = 10 : i32, message = "bqk,bkd->bqd"}> : () -> ()
    %cst_24 = arith.constant dense<0.000000e+00> : vector<1x8x8xf32>
    %39 = tpu.matmul %38, %25, %cst_24 {dimension_numbers = #tpu.dot_dimension_numbers<[2], [1], [1], [2], [0, 0, 0, 1, 1, 2], [0], [0]>} : vector<1x8x8xbf16>, vector<1x8x8xbf16>, vector<1x8x8xf32> -> vector<1x8x8xf32>
    "tpu.trace_stop"() : () -> ()
    %40 = vector.shape_cast %39 : vector<1x8x8xf32> to vector<8x8xf32>
    %41 = arith.truncf %40 : vector<8x8xf32> to vector<8x8xbf16>
    %c0_25 = arith.constant 0 : index
    %c0_26 = arith.constant 0 : index
    %42 = vector.load %arg8[%c0_25, %c0_26] : memref<32x32xbf16, #tpu.memory_space<vmem>>, vector<8x32xbf16>
    %cst_27 = arith.constant dense<0.000000e+00> : vector<8x32xf32>
    %43 = tpu.matmul %41, %42, %cst_27 {dimension_numbers = #tpu.dot_dimension_numbers<[1], [0], [0], [1], [0, 0, 1, 1], [], []>} : vector<8x8xbf16>, vector<8x32xbf16>, vector<8x32xf32> -> vector<8x32xf32>
    %44 = arith.addf %22, %43 : vector<8x32xf32>
    %45 = vector.extract_strided_slice %17 {offsets = [0, 0, 8], sizes = [1, 8, 8], strides = [1, 1, 1]} : vector<1x8x32xbf16> to vector<1x8x8xbf16>
    %46 = vector.extract_strided_slice %18 {offsets = [0, 0, 8], sizes = [1, 8, 8], strides = [1, 1, 1]} : vector<1x8x32xbf16> to vector<1x8x8xbf16>
    %47 = vector.extract_strided_slice %19 {offsets = [0, 0, 8], sizes = [1, 8, 8], strides = [1, 1, 1]} : vector<1x8x32xbf16> to vector<1x8x8xbf16>
    "tpu.trace_start"() <{level = 10 : i32, message = "bqd,bkd->bqk"}> : () -> ()
    %cst_28 = arith.constant dense<0.000000e+00> : vector<1x8x8xf32>
    %48 = tpu.matmul %45, %46, %cst_28 {dimension_numbers = #tpu.dot_dimension_numbers<[2], [2], [1], [1], [0, 0, 0, 1, 1, 1], [0], [0]>} : vector<1x8x8xbf16>, vector<1x8x8xbf16>, vector<1x8x8xf32> -> vector<1x8x8xf32>
    "tpu.trace_stop"() : () -> ()
    %49 = arith.addf %48, %21 : vector<1x8x8xf32>
    %cst_29 = arith.constant dense<0xFF800000> : vector<1x8xf32>
    %50 = vector.multi_reduction <maximumf>, %49, %cst_29 [2] : vector<1x8x8xf32> to vector<1x8xf32>
    %51 = vector.shape_cast %50 : vector<1x8xf32> to vector<1x8x1xf32>
    %52 = vector.broadcast %51 : vector<1x8x1xf32> to vector<1x8x8xf32>
    %53 = arith.subf %49, %52 : vector<1x8x8xf32>
    %54 = math.exp %53 : vector<1x8x8xf32>
    %cst_30 = arith.constant dense<0.000000e+00> : vector<1x8xf32>
    %55 = vector.multi_reduction <add>, %54, %cst_30 [2] : vector<1x8x8xf32> to vector<1x8xf32>
    %56 = vector.shape_cast %55 : vector<1x8xf32> to vector<1x8x1xf32>
    %57 = tpu.reciprocal %56 {approx = true} : vector<1x8x1xf32> -> vector<1x8x1xf32>
    %58 = vector.broadcast %57 : vector<1x8x1xf32> to vector<1x8x8xf32>
    %59 = arith.mulf %54, %58 : vector<1x8x8xf32>
    %60 = arith.truncf %59 : vector<1x8x8xf32> to vector<1x8x8xbf16>
    "tpu.trace_start"() <{level = 10 : i32, message = "bqk,bkd->bqd"}> : () -> ()
    %cst_31 = arith.constant dense<0.000000e+00> : vector<1x8x8xf32>
    %61 = tpu.matmul %60, %47, %cst_31 {dimension_numbers = #tpu.dot_dimension_numbers<[2], [1], [1], [2], [0, 0, 0, 1, 1, 2], [0], [0]>} : vector<1x8x8xbf16>, vector<1x8x8xbf16>, vector<1x8x8xf32> -> vector<1x8x8xf32>
    "tpu.trace_stop"() : () -> ()
    %62 = vector.shape_cast %61 : vector<1x8x8xf32> to vector<8x8xf32>
    %63 = arith.truncf %62 : vector<8x8xf32> to vector<8x8xbf16>
    %c8 = arith.constant 8 : index
    %c0_32 = arith.constant 0 : index
    %64 = vector.load %arg8[%c8, %c0_32] : memref<32x32xbf16, #tpu.memory_space<vmem>>, vector<8x32xbf16>
    %cst_33 = arith.constant dense<0.000000e+00> : vector<8x32xf32>
    %65 = tpu.matmul %63, %64, %cst_33 {dimension_numbers = #tpu.dot_dimension_numbers<[1], [0], [0], [1], [0, 0, 1, 1], [], []>} : vector<8x8xbf16>, vector<8x32xbf16>, vector<8x32xf32> -> vector<8x32xf32>
    %66 = arith.addf %44, %65 : vector<8x32xf32>
    %67 = vector.extract_strided_slice %17 {offsets = [0, 0, 16], sizes = [1, 8, 8], strides = [1, 1, 1]} : vector<1x8x32xbf16> to vector<1x8x8xbf16>
    %68 = vector.extract_strided_slice %18 {offsets = [0, 0, 16], sizes = [1, 8, 8], strides = [1, 1, 1]} : vector<1x8x32xbf16> to vector<1x8x8xbf16>
    %69 = vector.extract_strided_slice %19 {offsets = [0, 0, 16], sizes = [1, 8, 8], strides = [1, 1, 1]} : vector<1x8x32xbf16> to vector<1x8x8xbf16>
    "tpu.trace_start"() <{level = 10 : i32, message = "bqd,bkd->bqk"}> : () -> ()
    %cst_34 = arith.constant dense<0.000000e+00> : vector<1x8x8xf32>
    %70 = tpu.matmul %67, %68, %cst_34 {dimension_numbers = #tpu.dot_dimension_numbers<[2], [2], [1], [1], [0, 0, 0, 1, 1, 1], [0], [0]>} : vector<1x8x8xbf16>, vector<1x8x8xbf16>, vector<1x8x8xf32> -> vector<1x8x8xf32>
    "tpu.trace_stop"() : () -> ()
    %71 = arith.addf %70, %21 : vector<1x8x8xf32>
    %cst_35 = arith.constant dense<0xFF800000> : vector<1x8xf32>
    %72 = vector.multi_reduction <maximumf>, %71, %cst_35 [2] : vector<1x8x8xf32> to vector<1x8xf32>
    %73 = vector.shape_cast %72 : vector<1x8xf32> to vector<1x8x1xf32>
    %74 = vector.broadcast %73 : vector<1x8x1xf32> to vector<1x8x8xf32>
    %75 = arith.subf %71, %74 : vector<1x8x8xf32>
    %76 = math.exp %75 : vector<1x8x8xf32>
    %cst_36 = arith.constant dense<0.000000e+00> : vector<1x8xf32>
    %77 = vector.multi_reduction <add>, %76, %cst_36 [2] : vector<1x8x8xf32> to vector<1x8xf32>
    %78 = vector.shape_cast %77 : vector<1x8xf32> to vector<1x8x1xf32>
    %79 = tpu.reciprocal %78 {approx = true} : vector<1x8x1xf32> -> vector<1x8x1xf32>
    %80 = vector.broadcast %79 : vector<1x8x1xf32> to vector<1x8x8xf32>
    %81 = arith.mulf %76, %80 : vector<1x8x8xf32>
    %82 = arith.truncf %81 : vector<1x8x8xf32> to vector<1x8x8xbf16>
    "tpu.trace_start"() <{level = 10 : i32, message = "bqk,bkd->bqd"}> : () -> ()
    %cst_37 = arith.constant dense<0.000000e+00> : vector<1x8x8xf32>
    %83 = tpu.matmul %82, %69, %cst_37 {dimension_numbers = #tpu.dot_dimension_numbers<[2], [1], [1], [2], [0, 0, 0, 1, 1, 2], [0], [0]>} : vector<1x8x8xbf16>, vector<1x8x8xbf16>, vector<1x8x8xf32> -> vector<1x8x8xf32>
    "tpu.trace_stop"() : () -> ()
    %84 = vector.shape_cast %83 : vector<1x8x8xf32> to vector<8x8xf32>
    %85 = arith.truncf %84 : vector<8x8xf32> to vector<8x8xbf16>
    %c16 = arith.constant 16 : index
    %c0_38 = arith.constant 0 : index
    %86 = vector.load %arg8[%c16, %c0_38] : memref<32x32xbf16, #tpu.memory_space<vmem>>, vector<8x32xbf16>
    %cst_39 = arith.constant dense<0.000000e+00> : vector<8x32xf32>
    %87 = tpu.matmul %85, %86, %cst_39 {dimension_numbers = #tpu.dot_dimension_numbers<[1], [0], [0], [1], [0, 0, 1, 1], [], []>} : vector<8x8xbf16>, vector<8x32xbf16>, vector<8x32xf32> -> vector<8x32xf32>
    %88 = arith.addf %66, %87 : vector<8x32xf32>
    %89 = vector.extract_strided_slice %17 {offsets = [0, 0, 24], sizes = [1, 8, 8], strides = [1, 1, 1]} : vector<1x8x32xbf16> to vector<1x8x8xbf16>
    %90 = vector.extract_strided_slice %18 {offsets = [0, 0, 24], sizes = [1, 8, 8], strides = [1, 1, 1]} : vector<1x8x32xbf16> to vector<1x8x8xbf16>
    %91 = vector.extract_strided_slice %19 {offsets = [0, 0, 24], sizes = [1, 8, 8], strides = [1, 1, 1]} : vector<1x8x32xbf16> to vector<1x8x8xbf16>
    "tpu.trace_start"() <{level = 10 : i32, message = "bqd,bkd->bqk"}> : () -> ()
    %cst_40 = arith.constant dense<0.000000e+00> : vector<1x8x8xf32>
    %92 = tpu.matmul %89, %90, %cst_40 {dimension_numbers = #tpu.dot_dimension_numbers<[2], [2], [1], [1], [0, 0, 0, 1, 1, 1], [0], [0]>} : vector<1x8x8xbf16>, vector<1x8x8xbf16>, vector<1x8x8xf32> -> vector<1x8x8xf32>
    "tpu.trace_stop"() : () -> ()
    %93 = arith.addf %92, %21 : vector<1x8x8xf32>
    %cst_41 = arith.constant dense<0xFF800000> : vector<1x8xf32>
    %94 = vector.multi_reduction <maximumf>, %93, %cst_41 [2] : vector<1x8x8xf32> to vector<1x8xf32>
    %95 = vector.shape_cast %94 : vector<1x8xf32> to vector<1x8x1xf32>
    %96 = vector.broadcast %95 : vector<1x8x1xf32> to vector<1x8x8xf32>
    %97 = arith.subf %93, %96 : vector<1x8x8xf32>
    %98 = math.exp %97 : vector<1x8x8xf32>
    %cst_42 = arith.constant dense<0.000000e+00> : vector<1x8xf32>
    %99 = vector.multi_reduction <add>, %98, %cst_42 [2] : vector<1x8x8xf32> to vector<1x8xf32>
    %100 = vector.shape_cast %99 : vector<1x8xf32> to vector<1x8x1xf32>
    %101 = tpu.reciprocal %100 {approx = true} : vector<1x8x1xf32> -> vector<1x8x1xf32>
    %102 = vector.broadcast %101 : vector<1x8x1xf32> to vector<1x8x8xf32>
    %103 = arith.mulf %98, %102 : vector<1x8x8xf32>
    %104 = arith.truncf %103 : vector<1x8x8xf32> to vector<1x8x8xbf16>
    "tpu.trace_start"() <{level = 10 : i32, message = "bqk,bkd->bqd"}> : () -> ()
    %cst_43 = arith.constant dense<0.000000e+00> : vector<1x8x8xf32>
    %105 = tpu.matmul %104, %91, %cst_43 {dimension_numbers = #tpu.dot_dimension_numbers<[2], [1], [1], [2], [0, 0, 0, 1, 1, 2], [0], [0]>} : vector<1x8x8xbf16>, vector<1x8x8xbf16>, vector<1x8x8xf32> -> vector<1x8x8xf32>
    "tpu.trace_stop"() : () -> ()
    %106 = vector.shape_cast %105 : vector<1x8x8xf32> to vector<8x8xf32>
    %107 = arith.truncf %106 : vector<8x8xf32> to vector<8x8xbf16>
    %c24 = arith.constant 24 : index
    %c0_44 = arith.constant 0 : index
    %108 = vector.load %arg8[%c24, %c0_44] : memref<32x32xbf16, #tpu.memory_space<vmem>>, vector<8x32xbf16>
    %cst_45 = arith.constant dense<0.000000e+00> : vector<8x32xf32>
    %109 = tpu.matmul %107, %108, %cst_45 {dimension_numbers = #tpu.dot_dimension_numbers<[1], [0], [0], [1], [0, 0, 1, 1], [], []>} : vector<8x8xbf16>, vector<8x32xbf16>, vector<8x32xf32> -> vector<8x32xf32>
    %110 = arith.addf %88, %109 : vector<8x32xf32>
    %c0_46 = arith.constant 0 : index
    %c0_47 = arith.constant 0 : index
    %111 = vector.load %arg9[%c0_46, %c0_47] : memref<1x32xf32, #tpu.memory_space<vmem>>, vector<1x32xf32>
    %112 = vector.broadcast %111 : vector<1x32xf32> to vector<8x32xf32>
    %113 = arith.addf %110, %112 : vector<8x32xf32>
    %114 = arith.extf %5 : vector<8x32xbf16> to vector<8x32xf32>
    %115 = arith.addf %113, %114 : vector<8x32xf32>
    %cst_48 = arith.constant dense<0.000000e+00> : vector<8xf32>
    %116 = vector.multi_reduction <add>, %115, %cst_48 [1] : vector<8x32xf32> to vector<8xf32>
    %117 = vector.shape_cast %116 : vector<8xf32> to vector<8x1xf32>
    %cst_49 = arith.constant 3.200000e+01 : f32
    %118 = vector.broadcast %cst_49 : f32 to vector<8x1xf32>
    %119 = arith.divf %117, %118 : vector<8x1xf32>
    %120 = vector.broadcast %119 : vector<8x1xf32> to vector<8x32xf32>
    %121 = arith.subf %115, %120 : vector<8x32xf32>
    %122 = arith.mulf %121, %121 : vector<8x32xf32>
    %cst_50 = arith.constant dense<0.000000e+00> : vector<8xf32>
    %123 = vector.multi_reduction <add>, %122, %cst_50 [1] : vector<8x32xf32> to vector<8xf32>
    %124 = vector.shape_cast %123 : vector<8xf32> to vector<8x1xf32>
    %cst_51 = arith.constant 3.200000e+01 : f32
    %125 = vector.broadcast %cst_51 : f32 to vector<8x1xf32>
    %126 = arith.divf %124, %125 : vector<8x1xf32>
    %127 = vector.broadcast %119 : vector<8x1xf32> to vector<8x32xf32>
    %128 = arith.subf %115, %127 : vector<8x32xf32>
    %cst_52 = arith.constant 9.99999974E-6 : f32
    %129 = vector.broadcast %cst_52 : f32 to vector<8x1xf32>
    %130 = arith.addf %126, %129 : vector<8x1xf32>
    %131 = math.rsqrt %130 : vector<8x1xf32>
    %132 = vector.broadcast %131 : vector<8x1xf32> to vector<8x32xf32>
    %133 = arith.mulf %128, %132 : vector<8x32xf32>
    %c0_53 = arith.constant 0 : index
    %c0_54 = arith.constant 0 : index
    %134 = vector.load %arg10[%c0_53, %c0_54] : memref<1x32xf32, #tpu.memory_space<vmem>>, vector<1x32xf32>
    %135 = vector.broadcast %134 : vector<1x32xf32> to vector<8x32xf32>
    %136 = arith.mulf %133, %135 : vector<8x32xf32>
    %c0_55 = arith.constant 0 : index
    %c0_56 = arith.constant 0 : index
    %137 = vector.load %arg11[%c0_55, %c0_56] : memref<1x32xf32, #tpu.memory_space<vmem>>, vector<1x32xf32>
    %138 = vector.broadcast %137 : vector<1x32xf32> to vector<8x32xf32>
    %139 = arith.addf %136, %138 : vector<8x32xf32>
    %140 = arith.truncf %139 : vector<8x32xf32> to vector<8x32xbf16>
    %c0_57 = arith.constant 0 : index
    %c0_58 = arith.constant 0 : index
    %141 = vector.load %arg14[%c0_57, %c0_58] : memref<32x128xbf16, #tpu.memory_space<vmem>>, vector<32x128xbf16>
    %cst_59 = arith.constant dense<0.000000e+00> : vector<8x128xf32>
    %142 = tpu.matmul %140, %141, %cst_59 {dimension_numbers = #tpu.dot_dimension_numbers<[1], [0], [0], [1], [0, 0, 1, 1], [], []>} : vector<8x32xbf16>, vector<32x128xbf16>, vector<8x128xf32> -> vector<8x128xf32>
    %c0_60 = arith.constant 0 : index
    %c0_61 = arith.constant 0 : index
    %143 = vector.load %arg15[%c0_60, %c0_61] : memref<1x128xf32, #tpu.memory_space<vmem>>, vector<1x128xf32>
    %144 = vector.broadcast %143 : vector<1x128xf32> to vector<8x128xf32>
    %145 = arith.addf %142, %144 : vector<8x128xf32>
    %cst_62 = arith.constant 0.000000e+00 : f32
    %146 = vector.broadcast %cst_62 : f32 to vector<8x128xf32>
    %147 = arith.maximumf %145, %146 : vector<8x128xf32>
    %148 = arith.truncf %147 : vector<8x128xf32> to vector<8x128xbf16>
    %c0_63 = arith.constant 0 : index
    %c0_64 = arith.constant 0 : index
    %149 = vector.load %arg16[%c0_63, %c0_64] : memref<128x32xbf16, #tpu.memory_space<vmem>>, vector<128x32xbf16>
    %cst_65 = arith.constant dense<0.000000e+00> : vector<8x32xf32>
    %150 = tpu.matmul %148, %149, %cst_65 {dimension_numbers = #tpu.dot_dimension_numbers<[1], [0], [0], [1], [0, 0, 1, 1], [], []>} : vector<8x128xbf16>, vector<128x32xbf16>, vector<8x32xf32> -> vector<8x32xf32>
    %c0_66 = arith.constant 0 : index
    %c0_67 = arith.constant 0 : index
    %151 = vector.load %arg17[%c0_66, %c0_67] : memref<1x32xf32, #tpu.memory_space<vmem>>, vector<1x32xf32>
    %152 = vector.broadcast %151 : vector<1x32xf32> to vector<8x32xf32>
    %153 = arith.addf %150, %152 : vector<8x32xf32>
    %154 = arith.addf %153, %139 : vector<8x32xf32>
    %cst_68 = arith.constant dense<0.000000e+00> : vector<8xf32>
    %155 = vector.multi_reduction <add>, %154, %cst_68 [1] : vector<8x32xf32> to vector<8xf32>
    %156 = vector.shape_cast %155 : vector<8xf32> to vector<8x1xf32>
    %cst_69 = arith.constant 3.200000e+01 : f32
    %157 = vector.broadcast %cst_69 : f32 to vector<8x1xf32>
    %158 = arith.divf %156, %157 : vector<8x1xf32>
    %159 = vector.broadcast %158 : vector<8x1xf32> to vector<8x32xf32>
    %160 = arith.subf %154, %159 : vector<8x32xf32>
    %161 = arith.mulf %160, %160 : vector<8x32xf32>
    %cst_70 = arith.constant dense<0.000000e+00> : vector<8xf32>
    %162 = vector.multi_reduction <add>, %161, %cst_70 [1] : vector<8x32xf32> to vector<8xf32>
    %163 = vector.shape_cast %162 : vector<8xf32> to vector<8x1xf32>
    %cst_71 = arith.constant 3.200000e+01 : f32
    %164 = vector.broadcast %cst_71 : f32 to vector<8x1xf32>
    %165 = arith.divf %163, %164 : vector<8x1xf32>
    %166 = vector.broadcast %158 : vector<8x1xf32> to vector<8x32xf32>
    %167 = arith.subf %154, %166 : vector<8x32xf32>
    %cst_72 = arith.constant 9.99999974E-6 : f32
    %168 = vector.broadcast %cst_72 : f32 to vector<8x1xf32>
    %169 = arith.addf %165, %168 : vector<8x1xf32>
    %170 = math.rsqrt %169 : vector<8x1xf32>
    %171 = vector.broadcast %170 : vector<8x1xf32> to vector<8x32xf32>
    %172 = arith.mulf %167, %171 : vector<8x32xf32>
    %c0_73 = arith.constant 0 : index
    %c0_74 = arith.constant 0 : index
    %173 = vector.load %arg12[%c0_73, %c0_74] : memref<1x32xf32, #tpu.memory_space<vmem>>, vector<1x32xf32>
    %174 = vector.broadcast %173 : vector<1x32xf32> to vector<8x32xf32>
    %175 = arith.mulf %172, %174 : vector<8x32xf32>
    %c0_75 = arith.constant 0 : index
    %c0_76 = arith.constant 0 : index
    %176 = vector.load %arg13[%c0_75, %c0_76] : memref<1x32xf32, #tpu.memory_space<vmem>>, vector<1x32xf32>
    %177 = vector.broadcast %176 : vector<1x32xf32> to vector<8x32xf32>
    %178 = arith.addf %175, %177 : vector<8x32xf32>
    %179 = vector.shape_cast %178 : vector<8x32xf32> to vector<1x8x32xf32>
    %c0_77 = arith.constant 0 : index
    %c0_78 = arith.constant 0 : index
    %c0_79 = arith.constant 0 : index
    %180 = vector.load %arg18[%c0_77, %c0_78, %c0_79] : memref<1x8x32xf32, #tpu.memory_space<vmem>>, vector<1x8x32xf32>
    tpu.vector_store %arg18[%c0_77, %c0_78, %c0_79], %179 {strides = array<i32>} : memref<1x8x32xf32, #tpu.memory_space<vmem>>, vector<1x8x32xf32>,
    return
  }
  func.func @transform_0(%arg0: i32) -> (i32, i32, i32) {
    %c0_i32 = arith.constant 0 : i32
    %c0_i32_0 = arith.constant 0 : i32
    %c0_i32_1 = arith.constant 0 : i32
    return %arg0, %c0_i32, %c0_i32_0 : i32, i32, i32
  }
  func.func @transform_1(%arg0: i32) -> (i32, i32, i32) {
    %c0_i32 = arith.constant 0 : i32
    %c0_i32_0 = arith.constant 0 : i32
    %c0_i32_1 = arith.constant 0 : i32
    return %arg0, %c0_i32, %c0_i32_0 : i32, i32, i32
  }
  func.func @transform_2(%arg0: i32) -> (i32, i32, i32) {
    %c0_i32 = arith.constant 0 : i32
    %c0_i32_0 = arith.constant 0 : i32
    %c0_i32_1 = arith.constant 0 : i32
    return %arg0, %c0_i32, %c0_i32_0 : i32, i32, i32
  }
  func.func @transform_3(%arg0: i32) -> (i32, i32, i32) {
    %c0_i32 = arith.constant 0 : i32
    %c0_i32_0 = arith.constant 0 : i32
    %c0_i32_1 = arith.constant 0 : i32
    return %arg0, %c0_i32, %c0_i32_0 : i32, i32, i32
  }
  func.func @transform_4(%arg0: i32) -> (i32, i32) {
    %c0_i32 = arith.constant 0 : i32
    %c0_i32_0 = arith.constant 0 : i32
    %c0_i32_1 = arith.constant 0 : i32
    return %c0_i32, %c0_i32_0 : i32, i32
  }
  func.func @transform_5(%arg0: i32) -> (i32, i32) {
    %c0_i32 = arith.constant 0 : i32
    %c0_i32_0 = arith.constant 0 : i32
    %c0_i32_1 = arith.constant 0 : i32
    return %c0_i32, %c0_i32_0 : i32, i32
  }
  func.func @transform_6(%arg0: i32) -> (i32, i32) {
    %c0_i32 = arith.constant 0 : i32
    %c0_i32_0 = arith.constant 0 : i32
    %c0_i32_1 = arith.constant 0 : i32
    return %c0_i32, %c0_i32_0 : i32, i32
  }
  func.func @transform_7(%arg0: i32) -> (i32, i32) {
    %c0_i32 = arith.constant 0 : i32
    %c0_i32_0 = arith.constant 0 : i32
    %c0_i32_1 = arith.constant 0 : i32
    return %c0_i32, %c0_i32_0 : i32, i32
  }
  func.func @transform_8(%arg0: i32) -> (i32, i32) {
    %c0_i32 = arith.constant 0 : i32
    %c0_i32_0 = arith.constant 0 : i32
    %c0_i32_1 = arith.constant 0 : i32
    return %c0_i32, %c0_i32_0 : i32, i32
  }
  func.func @transform_9(%arg0: i32) -> (i32, i32) {
    %c0_i32 = arith.constant 0 : i32
    %c0_i32_0 = arith.constant 0 : i32
    %c0_i32_1 = arith.constant 0 : i32
    return %c0_i32, %c0_i32_0 : i32, i32
  }
  func.func @transform_10(%arg0: i32) -> (i32, i32) {
    %c0_i32 = arith.constant 0 : i32
    %c0_i32_0 = arith.constant 0 : i32
    %c0_i32_1 = arith.constant 0 : i32
    return %c0_i32, %c0_i32_0 : i32, i32
  }
  func.func @transform_11(%arg0: i32) -> (i32, i32) {
    %c0_i32 = arith.constant 0 : i32
    %c0_i32_0 = arith.constant 0 : i32
    %c0_i32_1 = arith.constant 0 : i32
    return %c0_i32, %c0_i32_0 : i32, i32
  }
  func.func @transform_12(%arg0: i32) -> (i32, i32) {
    %c0_i32 = arith.constant 0 : i32
    %c0_i32_0 = arith.constant 0 : i32
    %c0_i32_1 = arith.constant 0 : i32
    return %c0_i32, %c0_i32_0 : i32, i32
  }
  func.func @transform_13(%arg0: i32) -> (i32, i32) {
    %c0_i32 = arith.constant 0 : i32
    %c0_i32_0 = arith.constant 0 : i32
    %c0_i32_1 = arith.constant 0 : i32
    return %c0_i32, %c0_i32_0 : i32, i32
  }
  func.func @transform_14(%arg0: i32) -> (i32, i32) {
    %c0_i32 = arith.constant 0 : i32
    %c0_i32_0 = arith.constant 0 : i32
    %c0_i32_1 = arith.constant 0 : i32
    return %c0_i32, %c0_i32_0 : i32, i32
  }
  func.func @transform_15(%arg0: i32) -> (i32, i32) {
    %c0_i32 = arith.constant 0 : i32
    %c0_i32_0 = arith.constant 0 : i32
    %c0_i32_1 = arith.constant 0 : i32
    return %c0_i32, %c0_i32_0 : i32, i32
  }
  func.func @transform_16(%arg0: i32) -> (i32, i32) {
    %c0_i32 = arith.constant 0 : i32
    %c0_i32_0 = arith.constant 0 : i32
    %c0_i32_1 = arith.constant 0 : i32
    return %c0_i32, %c0_i32_0 : i32, i32
  }
  func.func @transform_17(%arg0: i32) -> (i32, i32, i32) {
    %c0_i32 = arith.constant 0 : i32
    %c0_i32_0 = arith.constant 0 : i32
    %c0_i32_1 = arith.constant 0 : i32
    return %arg0, %c0_i32, %c0_i32_0 : i32, i32, i32
  }
}

</mosaic_0001>

<bundles_post_ra>
// kernel: tpu_custom_call.1
= control target key start
LH: loop header
LB: loop body
LE: loop exit
PB: predicated region body
PF: predicated region fallthrough
CT: control target
= control target key end

     0   :  { %s2317_s0 = inlined_call_operand.hbm [shape: bf16[2,8,32], index: 0, kind: input, shape index: {}]   ;;  %s2318_s1 = inlined_call_operand.hbm [shape: bf16[2,8,32], index: 1, kind: input, shape index: {}]   ;;  %s2319_s2 = inlined_call_operand.hbm [shape: bf16[2,8,32], index: 2, kind: input, shape index: {}]   ;;  %s2320_s3 = inlined_call_operand.hbm [shape: bf16[2,8,8], index: 3, kind: input, shape index: {}]   ;;  %s2321_s4 = inlined_call_operand.vmem [shape: bf16[32,32], index: 4, kind: input, shape index: {}]   ;;  %s2322_s5 = inlined_call_operand.vmem [shape: bf16[32,32], index: 5, kind: input, shape index: {}]   ;;  %s2323_s6 = inlined_call_operand.vmem [shape: bf16[32,32], index: 6, kind: input, shape index: {}]   ;;  %s2324_s7 = inlined_call_operand.vmem [shape: bf16[32,32], index: 7, kind: input, shape index: {}]   ;;  %s2325_s8 = inlined_call_operand.vmem [shape: f32[1,32], index: 8, kind: input, shape index: {}]   ;;  %s2326_s9 = inlined_call_operand.vmem [shape: f32[1,32], index: 9, kind: input, shape index: {}]   ;;  %s2327_s10 = inlined_call_operand.vmem [shape: f32[1,32], index: 10, kind: input, shape index: {}]   ;;  %s2328_s11 = inlined_call_operand.vmem [shape: f32[1,32], index: 11, kind: input, shape index: {}]   ;;  %s2329_s12 = inlined_call_operand.vmem [shape: f32[1,32], index: 12, kind: input, shape index: {}]   ;;  %s2330_s13 = inlined_call_operand.vmem [shape: bf16[32,128], index: 13, kind: input, shape index: {}]   ;;  %s2331_s14 = inlined_call_operand.vmem [shape: f32[1,128], index: 14, kind: input, shape index: {}]   ;;  %s2332_s15 = inlined_call_operand.vmem [shape: bf16[128,32], index: 15, kind: input, shape index: {}]   ;;  %s2333_s16 = inlined_call_operand.vmem [shape: f32[1,32], index: 16, kind: input, shape index: {}]   ;;  %s2334_s17 = inlined_call_operand.hbm [shape: f32[2,8,32], index: 17, kind: output, shape index: {}]  }
   0x1   :  { %2349 = sst [smem:[#allocation22_spill]] %s2317_s0 }
   0x2   :  { %2350 = sst [smem:[#allocation23_spill]] %s2318_s1 }
   0x3   :  { %2351 = sst [smem:[#allocation24_spill]] %s2326_s9 }
   0x4   :  { %2352 = sst [smem:[#allocation25_spill]] %s2327_s10 }
   0x5   :  { %2353 = sst [smem:[#allocation26_spill]] %s2328_s11 }
   0x6   :  { %2354 = sst [smem:[#allocation27_spill]] %s2329_s12 }
   0x7   :  { %2355 = sst [smem:[#allocation28_spill]] %s2330_s13 }
   0x8   :  { %2356 = sst [smem:[#allocation29_spill]] %s2331_s14 }
   0x9   :  { %2357 = sst [smem:[#allocation30_spill]] %s2332_s15 }
   0xa   :  { %2358 = sst [smem:[#allocation31_spill]] %s2333_s16 }
   0xb   :  { %2359 = sst [smem:[#allocation32_spill]] %s2334_s17 }
   0xc   :  { %22 = vsyncpa [#allocation3], 0 }
   0xd   :  { %24 = vsyncpa [#allocation3 + $0x1], 0 }
   0xe   :  { %25 = vsyncpa [#allocation6], 0 }
   0xf   :  { %27 = vsyncpa [#allocation6 + $0x1], 0 }
  0x10   :  { %28 = vsyncpa [#allocation9], 0 }
  0x11   :  { %30 = vsyncpa [#allocation9 + $0x1], 0 }
  0x12   :  { %31 = vsyncpa [#allocation4], 0 }
  0x13   :  { %33 = vsyncpa [#allocation4 + $0x1], 0  ;;  %s1955_s24 = smov 0   ;;  %s1957_s25 = smov 0  }
  0x14   :  { %s1959_s26 = smov 0   ;;  %s1961_s27 = smov 0  }
  0x15 LB: > { %2360 = sst [smem:[#allocation15_spill]] %s1847_s24  ;;  %s1976_s28 = sadd.s32 4294967295, %s1859_s27   ;;  %s1859_s27 = sphi %s1961_s27, %s2389_s27   ;;  %s1855_s26 = sphi %s1959_s26, %s2391_s26   ;;  %s1851_s25 = sphi %s1957_s25, %s2393_s25   ;;  %s1847_s24 = sphi %s1955_s24, %s2392_s24  }
  0x16   : > { %2361 = sst [smem:[#allocation16_spill]] %s1855_s26  ;;  %s1454_s29 = sadd.s32 4294967294, %s1859_s27  }
  0x17   : > { %2362 = sst [smem:[#allocation17_spill]] %s1859_s27  ;;  %s1980_s0 = sadd.s32 1, %s1859_s27  }
  0x18   : > { %2363 = sst [smem:[#allocation18_spill]] %s1980_s0  ;;  %s46_s30 = sadd.s32 1, %s1855_s26 }
  0x19   : > { %s43_s18 = ssub.s32 %s1859_s27, %s1980_s0  ;;  %p53_p0 = scmp.ne.s32.totalorder %s1855_s26, %s1851_s25 }
  0x1a   : > { %p44_p1 = scmp.eq.s32.totalorder %s43_s18, 0  ;;  %p54_p2 = scmp.eq.s32.totalorder %s1859_s27, 0 }
  0x1b   : > { %p59_p3 = scmp.ne.s32.totalorder %s1851_s25, %s1847_s24  ;;  %p60_p4 = scmp.eq.s32.totalorder %s1976_s28, 0 }
  0x1c   : > { %s1992_s19 = scalar_select %p44_p1, %s1855_s26, %s46_s30  }
  0x1d   : > { %p55_p5 = por %p54_p2, %p53_p0  ;;  %p1994_p6 = por %p60_p4, %p59_p3 }
  0x1e   : > { %2364 = sst [smem:[#allocation19_spill]] %s1992_s19  ;;  %p434_p7 = scmp.eq.s32.totalorder %s1976_s28, 1 }
  0x1f   : > { %p440_p8 = scmp.eq.s32.totalorder %s1454_s29, 1  ;;  %p1456_p9 = scmp.ge.s32.totalorder %s1859_s27, 2 }
  0x20   : > { %p1598_p10 = scmp.lt.s32.totalorder %s1859_s27, 2  ;;  %p2001_p11 = por %p434_p7, %p53_p0 }
  0x21   : > { %p2005_p12 = por %p440_p8, %p59_p3  ;;  %s2010_s22 = sand.u32 1, %s1855_s26  }
  0x22   : > { %s2366_s20 = scalar_select %p2001_p11, 1, 0 }
  0x23   : > { %s2368_s21 = scalar_select %p2005_p12, 1, 0 }
  0x24   : > { %2367 = sst [smem:[#allocation20_spill]] %s2366_s20  ;;  %s2013_s23 = sshll.u32 %s1859_s27, 2 }
  0x25   : > { %2369 = sst [smem:[#allocation21_spill]] %s2368_s21  ;;  %s2016_s30 = sshll.u32 %s2010_s22, 2 }
  0x26   : > { %p2018_p13 = pnand %p1598_p10, %p55_p5  ;;  %s518_s18 = sand.u32 1, %s1859_s27  }
  0x27   : > { %s2371_s24 = sld [smem:[#allocation23_spill]]  ;;  %s522_s26 = scalar_lea.vmem [#allocation5], %s2016_s30 }
  0x28   : > { %s530_s20 = sshll.u32 %s522_s26, 4  ;;  %p1465_p0 = scmp.ge.s32.totalorder %s1859_s27, 1  ;;  %s531_s20 = int_to_ptr.vmem [resolvable:$true] %s530_s20 }
  0x29   : > { %s2029_s11 = scalar_lea.sflag [#allocation6], %s518_s18  ;;  %p1669_p2 = pneg %p2018_p13 }
  0x2d   : > { %s2372_s12 = smov %s2371_s24  ;;  %s526_s21 = scalar_lea.hbm %s2371_s24, %s2013_s23 }
  0x2e   : > { %s528_s17 = sshll.u32 %s526_s21, 4  ;;  %s1672_s26 = scalar_lea.hbm %s2372_s12, 8  ;;  %s529_s17 = int_to_ptr.hbm [resolvable:$true] %s528_s17 }
  0x2f   : > { %s1665_s16 = sshra.s32 %s529_s17, 4  ;;  %s1666_s16 = int_to_ptr.hbm [resolvable:$true] %s1665_s16 }
  0x30   : > { %s1667_s14 = scalar_lea.hbm %s1666_s16, 4  ;;  %p1673_p5 = scmp.lt.s32.totalorder %s1666_s16, %s2372_s12 }
  0x31   : > { %p1668_p1 = scmp.ne.s32.totalorder %s1666_s16, %s1667_s14  ;;  %p1674_p7 = scmp.lt.s32.totalorder %s1672_s26, %s1667_s14 }
  0x33   : > { %p1670_p3 = pnand %p1669_p2, %p1668_p1  ;;  %p1675_p8 = por %p1674_p7, %p1673_p5 }
  0x35   : > { %p1671_p4 = pneg %p1670_p3 }
  0x37   : > { %p1676_p10 = pnand %p1675_p8, %p1671_p4 }
  0x39   : > { %1679 = shalt.err (!%p1676_p10)
}
  0x3a   : > { %1587 = dma.hbm_to_vmem [thread:$0]  (!%p2018_p13), %s529_s17, 64, %s531_s20, %s2029_s11  }
  0x3b   : > { %p573_p1 = scmp.lt.s32.totalorder %s1859_s27, 3  ;;  %s2373_s24 = sld [smem:[#allocation22_spill]] }
  0x3c   : > { %s503_s26 = scalar_lea.vmem [#allocation2], %s2016_s30  ;;  %s500_s12 = scalar_lea.sflag [#allocation3], %s2010_s22 }
  0x3d   : > { %p2052_p3 = pnand %p1465_p0, %p573_p1  ;;  %s511_s21 = sshll.u32 %s503_s26, 4  ;;  %s512_s21 = int_to_ptr.vmem [resolvable:$true] %s511_s21 }
  0x41   : > { %s2374_s10 = smov %s2373_s24  ;;  %s507_s19 = scalar_lea.hbm %s2373_s24, %s2013_s23 }
  0x42   : > { %s509_s16 = sshll.u32 %s507_s19, 4  ;;  %s1702_s18 = scalar_lea.hbm %s2374_s10, 8  ;;  %s510_s16 = int_to_ptr.hbm [resolvable:$true] %s509_s16 }
  0x43   : > { %s1695_s9 = sshra.s32 %s510_s16, 4  ;;  %s1696_s9 = int_to_ptr.hbm [resolvable:$true] %s1695_s9 }
  0x44   : > { %s1697_s15 = scalar_lea.hbm %s1696_s9, 4  ;;  %p1703_p0 = scmp.lt.s32.totalorder %s1696_s9, %s2374_s10 }
  0x45   : > { %p1698_p4 = scmp.ne.s32.totalorder %s1696_s9, %s1697_s15  ;;  %p1704_p8 = scmp.lt.s32.totalorder %s1702_s18, %s1697_s15 }
  0x47   : > { %p1700_p5 = pnand %p1698_p4, %p1669_p2  ;;  %p1705_p10 = por %p1704_p8, %p1703_p0 }
  0x49   : > { %p1701_p7 = pneg %p1700_p5 }
  0x4b   : > { %p1706_p1 = pnand %p1705_p10, %p1701_p7 }
  0x4d   : > { %1709 = shalt.err (!%p1706_p1)
}
  0x4e   : > { %1584 = dma.hbm_to_vmem [thread:$0]  (!%p2018_p13), %s510_s16, 64, %s512_s21, %s500_s12  }
  0x4f   : > { %s545_s27 = scalar_lea.hbm %s2319_s2, %s2013_s23  ;;  %s541_s17 = scalar_lea.vmem [#allocation7], %s2016_s30 }
  0x50   : > { %s549_s20 = sshll.u32 %s541_s17, 4  ;;  %s547_s13 = sshll.u32 %s545_s27, 4  ;;  %s550_s20 = int_to_ptr.vmem [resolvable:$true] %s549_s20  ;;  %s548_s13 = int_to_ptr.hbm [resolvable:$true] %s547_s13 }
  0x51   : > { %s1725_s9 = sshra.s32 %s548_s13, 4  ;;  %s1732_s12 = scalar_lea.hbm %s2319_s2, 8  ;;  %s1726_s9 = int_to_ptr.hbm [resolvable:$true] %s1725_s9 }
  0x52   : > { %s1727_s15 = scalar_lea.hbm %s1726_s9, 4  ;;  %p1733_p0 = scmp.lt.s32.totalorder %s1726_s9, %s2319_s2 }
  0x53   : > { %p1728_p4 = scmp.ne.s32.totalorder %s1726_s9, %s1727_s15  ;;  %p1734_p8 = scmp.lt.s32.totalorder %s1732_s12, %s1727_s15 }
  0x55   : > { %p1730_p5 = pnand %p1728_p4, %p1669_p2  ;;  %p1735_p10 = por %p1734_p8, %p1733_p0 }
  0x57   : > { %p1731_p7 = pneg %p1730_p5 }
  0x59   : > { %p1736_p1 = pnand %p1735_p10, %p1731_p7 }
  0x5b   : > { %1739 = shalt.err (!%p1736_p1)
}
  0x5c   : > { %1590 = dma.hbm_to_vmem [thread:$0]  (!%p2018_p13), %s548_s13, 64, %s550_s20, %s2029_s11  }
  0x5d   : > { %s564_s19 = scalar_lea.hbm %s2320_s3, %s2013_s23  ;;  %s560_s17 = scalar_lea.vmem [#allocation8], %s2016_s30 }
  0x5e   : > { %s566_s26 = sshll.u32 %s564_s19, 4  ;;  %s568_s18 = sshll.u32 %s560_s17, 4  ;;  %s567_s26 = int_to_ptr.hbm [resolvable:$true] %s566_s26  ;;  %s569_s18 = int_to_ptr.vmem [resolvable:$true] %s568_s18 }
  0x5f   : > { %s557_s9 = scalar_lea.sflag [#allocation9], %s2010_s22  ;;  %s1755_s15 = sshra.s32 %s567_s26, 4  ;;  %s1756_s15 = int_to_ptr.hbm [resolvable:$true] %s1755_s15 }
  0x60   : > { %s1757_s0 = scalar_lea.hbm %s1756_s15, 4  ;;  %s1762_s13 = scalar_lea.hbm %s2320_s3, 8 }
  0x61   : > { %p1758_p4 = scmp.ne.s32.totalorder %s1756_s15, %s1757_s0  ;;  %p1763_p0 = scmp.lt.s32.totalorder %s1756_s15, %s2320_s3 }
  0x62   : > { %p1764_p8 = scmp.lt.s32.totalorder %s1762_s13, %s1757_s0 }
  0x63   : > { %p1760_p5 = pnand %p1758_p4, %p1669_p2 }
  0x64   : > { %p1765_p10 = por %p1764_p8, %p1763_p0 }
  0x65   : > { %p1761_p7 = pneg %p1760_p5 }
  0x67   : > { %p1766_p1 = pnand %p1765_p10, %p1761_p7 }
  0x69   : > { %1769 = shalt.err (!%p1766_p1)
}
  0x6a   : > { %1593 = dma.hbm_to_vmem [thread:$0]  (!%p2018_p13), %s567_s26, 64, %s569_s18, %s557_s9  }
  0x6b   : > { %577 = sbr.rel (%p2052_p3) target bundleno = 2284 (0x8ec), region = 88  ;;  %s2106_s22 = sand.u32 (!%p2052_p3), 1, %s1851_s25  }
  0x6c   : > { %s2109_s30 = sshll.u32 (!%p2052_p3), %s2106_s22, 2  ;;  %s580_s16 = scalar_lea.sflag (!%p2052_p3), [#allocation3], %s2106_s22 }
  0x6d   : > { %s583_s21 = scalar_lea.vmem (!%p2052_p3), [#allocation2], %s2109_s30 }
  0x70   : > { %1830 = dma.done.wait (%p1994_p6), %s580_s16, 64  }
  0x71   : > { %1832 = vsyncadd (%p1994_p6), %s580_s16, 4294967232  ;;  %s589_s29 = sand.u32 1, %s1976_s28   ;;  %s593_s27 = scalar_lea.vmem [#allocation5], %s2109_s30 }
  0x72   : > { %s590_s14 = scalar_lea.sflag [#allocation6], %s589_s29 }
  0x73   : > { %1834 = dma.done.wait (%p1994_p6), %s590_s14, 128  }
  0x74   : > { %1836 = vsyncadd (%p1994_p6), %s590_s14, 4294967168  ;;  %s603_s24 = scalar_lea.vmem [#allocation7], %s2109_s30  ;;  %s610_s19 = scalar_lea.sflag [#allocation9], %s2106_s22 }
  0x75   : > { %s613_s26 = scalar_lea.vmem [#allocation8], %s2109_s30 }
  0x76   : > { %1838 = dma.done.wait (%p1994_p6), %s610_s19, 64  }
  0x77   : > { %1840 = vsyncadd (%p1994_p6), %s610_s19, 4294967232  ;;  %v1556_v0 = vld [vmem:[%s2321_s4 + $0x8] sm:$0xff]  ;;  %v1555_v2 = vld [vmem:[%s2321_s4] sm:$0xff]  ;;  %vm700_vm0 = vcmask 261120   ;;  %vm822_vm1 = vcmask 1043456   ;;  %vm787_vm2 = vcmask 64512  }
  0x78   : > { %v1560_v1 = vld [vmem:[%s2323_s6 + $0x8] sm:$0xff]  ;;  %710 = vmatpush.bf16.msra.mxu1 %v1556_v0  ;;  %v1559_v3 = vld [vmem:[%s2323_s6] sm:$0xff]  ;;  %v2145_v6 = vld [vmem:[%s603_s24] sm:$0xf]  ;;  %s1862_s29 = smov 120   ;;  %s1863_s14 = smov 104  }
  0x79   : > { %v1558_v4 = vld [vmem:[%s2322_s5 + $0x8] sm:$0xff]  ;;  %776 = vmatpush.bf16.msra.mxu2 %v1560_v1  ;;  %v1557_v7 = vld [vmem:[%s2322_s5] sm:$0xff]  ;;  %v785_v30 = vld [vmem:[%s613_s26] sm:$0xf]  ;;  %s2376_s13 = sld [smem:[#allocation28_spill]]  ;;  %s1470_s18 = sshll.u32 %s2106_s22, 3 }
  0x7a   : > { %v682_v5 = vld [vmem:[%s593_s27] sm:$0xf]  ;;  %v681_v8 = vld [vmem:[%s583_s21] sm:$0xf]  ;;  %s1861_s21 = smov 112   ;;  %v2170_v31 = vunpack.c.l.bf16 %v785_v30  ;;  %s2378_s12 = sld [smem:[#allocation24_spill]] }
  0x7b   : > { %v840_v52 = vld [vmem:[%s2324_s7] sm:$0xf]  ;;  %s2379_s1 = sld [smem:[#allocation25_spill]]  ;;  %s1552_s9 = sshll.u32 %s1976_s28, 3 }
  0x7c   : > { %711 = vmatpush.bf16.msra.mxu1 %v1555_v2  ;;  %v931_v53 = vsel %vm822_vm1, %v840_v52, 0  ;;  %s2380_s24 = sld [smem:[#allocation29_spill]]  ;;  %s679_s28 = scalar_lea.vmem [#allocation10], %s1470_s18 }
  0x7d   : > { %777 = vmatpush.bf16.msra.mxu2 %v1559_v3  ;;  %s2381_s17 = sld [smem:[#allocation31_spill]]  ;;  %s1315_s27 = sshll.u32 %s679_s28, 4  ;;  %s1316_s27 = int_to_ptr.vmem [resolvable:$true] %s1315_s27 }
  0x7e   : > { %s2385_s30 = sld [smem:[#allocation27_spill]]  ;;  %s1303_s19 = scalar_lea.sflag [#allocation4], %s2106_s22 }
  0x7f   : > { %1479 = vmatmul.msk.bf16.vlgmr.msra.gmra.mxu1 %vm700_vm0, %v682_v5 }
  0x80   : > { %743 = vmatpush.bf16.msrb.mxu1 %v1558_v4  ;;  %1497 = vmatmul.msk.bf16.vlgmr.msra.gmra.mxu2 %vm700_vm0, %v2145_v6 }
  0x84   : > { %744 = vmatpush.bf16.msrb.mxu1 %v1557_v7 }
  0x8f   : > { %1488 = vmatmul.msk.bf16.vlgmr.msrb.gmra.mxu1 %vm700_vm0, %v681_v8 }
  0xfc   : > { %v713_v9 = vpop.f32.mrf.mxu1 }
  0xfd   : > { %v2154_v10 = vpack.c.bf16 %v713_v9, %v713_v9 }
  0xff   : > { %v824_v11 = vsel %vm822_vm1, %v2154_v10, 0  ;;  %v883_v3 = vunpack.c.l.b16 %v2154_v10 }
 0x100   : > { %833 = vmatpush.bf16.msra.mxu0 %v824_v11 }
 0x101   : > { %v884_v5 = vpack.c.b16 %v883_v3, %v883_v3 }
 0x103   : > { %v779_v12 = vpop.f32.mrf.mxu2 }
 0x104   : > { %v715_v13 = vpop.f32.mrf.mxu1  ;;  %v783_v14 = vmul.f32 0.17677669, %v779_v12  ;;  %940 = vmatpush.bf16.msrb.mxu0 %v931_v53 }
 0x106   : > { %v784_v18 = vpack.c.bf16 %v783_v14, %v783_v14 }
 0x108   : > { %v842_v22 = vunpack.c.l.b16 %v784_v18 }
 0x10a   : > { %v843_v24 = vpack.c.b16 %v842_v22, %v842_v22 }
 0x10b   : > { %v781_v15 = vpop.f32.mrf.mxu2 }
 0x10c   : > { %v746_v16 = vpop.f32.mrf.mxu1 }
 0x10d   : > { %v750_v17 = vpack.c.bf16 %v746_v16, %v746_v16 }
 0x10f   : > { %v847_v19 = vunpack.c.l.b16 %v750_v17  ;;  %v792_v20 = vsel %vm787_vm2, %v750_v17, 0 }
 0x110   : > { %801 = vmatpush.bf16.xpose.msra.mxu3 %v792_v20 }
 0x111   : > { %v848_v21 = vpack.c.b16 %v847_v19, %v847_v19 }
 0x113   : > { %948 = vrot.lane.b32.xlu2 %v848_v21, %s1861_s21  ;;  %849 = vrot.lane.b32.xlu1 %v848_v21, %s1862_s29 }
 0x114   : > { %v748_v23 = vpop.f32.mrf.mxu1 }
 0x115   : > { %v907_v23 = vld [vmem:[%s2324_s7 + $0x4] sm:$0xf] }
 0x117   : > { %1498 = vmatmul.msk.bf16.vlgmr.msra.gmra.mxu3 %vm787_vm2, %v784_v18 }
 0x11b   : > { %946 = vrot.lane.b32.xlu2 %v843_v24, %s1861_s21  ;;  %844 = vrot.lane.b32.xlu1 %v843_v24, %s1862_s29 }
 0x123   : > { %1024 = vrot.lane.b32.xlu1 %v843_v24, %s1863_s14  ;;  %v912_v24 = vsel %vm822_vm1, %v907_v23, 0 }
 0x124   : > { %921 = vmatpush.bf16.msrb.mxu3 %v912_v24 }
 0x16d   : > { %v949_v25 = vpop.permute.xlu2 %948 }
 0x16e   : > { %v954_v28 = vsel %vm787_vm2, %v949_v25, 0  ;;  %v1003_v25 = vld [vmem:[%s2324_s7 + $0x8] sm:$0xf] }
 0x175   : > { %v947_v34 = vpop.permute.xlu2 %946 }
 0x185   : > { %v850_v26 = vpop.permute.xlu1 %849 }
 0x186   : > { %v855_v27 = vsel %vm787_vm2, %v850_v26, 0  ;;  %v1008_v26 = vsel %vm822_vm1, %v1003_v25, 0 }
 0x187   : > { %864 = vmatpush.bf16.xpose.msra.mxu1 %v855_v27  ;;  %1017 = vmatpush.bf16.msra.mxu3 %v1008_v26 }
 0x18d   : > { %v845_v29 = vpop.permute.xlu1 %844 }
 0x18e   : > { %1500 = vmatmul.msk.bf16.vlgmr.msra.gmra.mxu1 %vm787_vm2, %v845_v29 }
 0x18f   : > { %963 = vmatpush.bf16.xpose.msrb.mxu1 %v954_v28 }
 0x195   : > { %v1025_v55 = vpop.permute.xlu1 %1024 }
 0x19a   : > { %v803_v32 = vpop.f32.mrf.mxu3 }
 0x19b   : > { %v804_v33 = vadd.f32 %v803_v32, %v2170_v31 }
 0x19d   : > { %v807_v35 = vsel %vm787_vm2, %v804_v33, -inf }
 0x19e   : > { %1504 = vmatmul.msk.bf16.vlgmr.msrb.gmra.mxu1 %vm787_vm2, %v947_v34  ;;  %808 = vmax.xlane.f32.xlu0 %v807_v35 }
 0x1a2   : > { %v805_v36 = vpop.f32.mrf.mxu3 }
 0x20b   : > { %v866_v37 = vpop.f32.mrf.mxu1 }
 0x20c   : > { %v867_v38 = vadd.f32 %v866_v37, %v2170_v31 }
 0x20e   : > { %v870_v39 = vsel %vm787_vm2, %v867_v38, -inf }
 0x20f   : > { %871 = vmax.xlane.f32.xlu2 %v870_v39 }
 0x211   : > { %v809_v40 = vpop.xlane.xlu0 %808 }
 0x212   : > { %v810_v41 = vsub.f32 %v804_v33, %v809_v40 }
 0x213   : > { %v868_v42 = vpop.f32.mrf.mxu1 }
 0x214   : > { %v811_v43 = vmul.f32 1.442695, %v810_v41 }
 0x216   : > { %1643 = vpow2.f32 %v811_v43 }
 0x21b   : > { %v965_v44 = vpop.f32.mrf.mxu1 }
 0x21c   : > { %v1644_v45 = vpop.eup %1643  ;;  %v966_v46 = vadd.f32 %v965_v44, %v2170_v31 }
 0x21d   : > { %v813_v47 = vsel %vm787_vm2, %v1644_v45, 0.0 }
 0x21e   : > { %814 = vadd.xlane.f32.xlu0 %v813_v47  ;;  %v969_v48 = vsel %vm787_vm2, %v966_v46, -inf }
 0x21f   : > { %970 = vmax.xlane.f32.xlu1 %v969_v48 }
 0x223   : > { %v967_v49 = vpop.f32.mrf.mxu1 }
 0x232   : > { %1026 = vrot.lane.b32.xlu0 %v848_v21, %s1863_s14 }
 0x282   : > { %v872_v50 = vpop.xlane.xlu2 %871 }
 0x283   : > { %v873_v51 = vsub.f32 %v867_v38, %v872_v50 }
 0x285   : > { %v874_v54 = vmul.f32 1.442695, %v873_v51 }
 0x287   : > { %1645 = vpow2.f32 %v874_v54 }
 0x28d   : > { %v1646_v56 = vpop.eup %1645 }
 0x28e   : > { %v876_v57 = vsel %vm787_vm2, %v1646_v56, 0.0 }
 0x28f   : > { %877 = vadd.xlane.f32.xlu2 %v876_v57 }
 0x291   : > { %v815_v58 = vpop.xlane.xlu0 %814 }
 0x292   : > { %1647 = vrcp.f32 %v815_v58  ;;  %v971_v59 = vpop.xlane.xlu1 %970 }
 0x293   : > { %v972_v60 = vsub.f32 %v966_v46, %v971_v59 }
 0x295   : > { %v973_v61 = vmul.f32 1.442695, %v972_v60 }
 0x297   : > { %1649 = vpow2.f32 %v973_v61  ;;  %v1636_v61 = vld [vmem:[%s2325_s8] ss:$0 sm:$0xff] }
 0x298   : > { %v1648_v62 = vpop.eup %1647 }
 0x299   : > { %v817_v63 = vmul.f32 %v1648_v62, %v1644_v45 }
 0x29b   : > { %v818_v0 = vpack.c.bf16 %v817_v63, %v817_v63  ;;  %v1107_v63 = vunpack.c.l.bf16 %v2145_v6 }
 0x29d   : > { %v1650_v1 = vpop.eup %1649  ;;  %1499 = vmatmul.msk.bf16.vlgmr.msra.gmra.mxu0 %vm787_vm2, %v818_v0 }
 0x29e   : > { %v975_v2 = vsel %vm787_vm2, %v1650_v1, 0.0 }
 0x29f   : > { %976 = vadd.xlane.f32.xlu1 %v975_v2 }
 0x2a4   : > { %v1027_v4 = vpop.permute.xlu0 %1026 }
 0x2a5   : > { %v1032_v7 = vsel %vm787_vm2, %v1027_v4, 0 }
 0x2a6   : > { %1041 = vmatpush.bf16.xpose.msra.mxu0 %v1032_v7 }
 0x2a7   : > { %885 = vrot.lane.b32.xlu2 %v884_v5, %s1862_s29 }
 0x2b8   : > { %981 = vrot.lane.b32.xlu1 %v884_v5, %s1861_s21  ;;  %s2377_s21 = sld [smem:[#allocation30_spill]] }
 0x2be   : > { %v1568_v24 = vld [vmem:[%s2377_s21 + $0x28] sm:$0xff]  ;;  %v1567_v25 = vld [vmem:[%s2377_s21 + $0x20] sm:$0xff] }
 0x302   : > { %v878_v8 = vpop.xlane.xlu2 %877 }
 0x303   : > { %1651 = vrcp.f32 %v878_v8 }
 0x309   : > { %v1652_v9 = vpop.eup %1651 }
 0x30a   : > { %v880_v11 = vmul.f32 %v1652_v9, %v1646_v56  ;;  %v886_v12 = vpop.permute.xlu2 %885  ;;  %v1081_v56 = vld [vmem:[%s2324_s7 + $0xc] sm:$0xf] }
 0x30b   : > { %v891_v13 = vsel %vm822_vm1, %v886_v12, 0  ;;  %v1086_v57 = vsel %vm822_vm1, %v1081_v56, 0 }
 0x30c   : > { %900 = vmatpush.bf16.msrb.mxu2 %v891_v13  ;;  %v881_v14 = vpack.c.bf16 %v880_v11, %v880_v11 }
 0x30f   : > { %1501 = vmatmul.msk.bf16.vlgmr.msrb.gmra.mxu2 %vm787_vm2, %v881_v14 }
 0x312   : > { %v977_v16 = vpop.xlane.xlu1 %976 }
 0x313   : > { %1653 = vrcp.f32 %v977_v16 }
 0x319   : > { %v1654_v18 = vpop.eup %1653 }
 0x31a   : > { %v835_v10 = vpop.f32.mrf.mxu0  ;;  %v979_v19 = vmul.f32 %v1654_v18, %v1650_v1  ;;  %v1561_v18 = vld [vmem:[%s2376_s13] sm:$0xff] }
 0x31b   : > { %v839_v15 = vpack.c.bf16 %v835_v10, %v835_v10 }
 0x31c   : > { %v980_v22 = vpack.c.bf16 %v979_v19, %v979_v19  ;;  %v1570_v19 = vld [vmem:[%s2377_s21 + $0x38] sm:$0xff] }
 0x31d   : > { %1503 = vmatmul.msk.bf16.vlgmr.msrb.gmra.mxu0 %vm787_vm2, %v839_v15 }
 0x31e   : > { %1255 = vmatpush.bf16.msrb.mxu0 %v1570_v19 }
 0x322   : > { %v837_v17 = vpop.f32.mrf.mxu0 }
 0x323   : > { %v1562_v17 = vld [vmem:[%s2376_s13 + $0x8] sm:$0xff] }
 0x32a   : > { %v982_v20 = vpop.permute.xlu1 %981 }
 0x32b   : > { %v987_v21 = vsel %vm822_vm1, %v982_v20, 0 }
 0x32c   : > { %996 = vmatpush.bf16.msra.mxu2 %v987_v21 }
 0x32d   : > { %1507 = vmatmul.msk.bf16.vlgmr.msra.gmra.mxu0 %vm787_vm2, %v1025_v55 }
 0x32f   : > { %1505 = vmatmul.msk.bf16.vlgmr.msra.gmra.mxu2 %vm787_vm2, %v980_v22  ;;  %v1569_v22 = vld [vmem:[%s2377_s21 + $0x30] sm:$0xff] }
 0x330   : > { %1095 = vmatpush.bf16.msrb.mxu2 %v1086_v57  ;;  %1256 = vmatpush.bf16.msrb.mxu0 %v1569_v22 }
 0x334   : > { %1257 = vmatpush.bf16.msrb.mxu0 %v1568_v24 }
 0x338   : > { %1258 = vmatpush.bf16.msrb.mxu0 %v1567_v25 }
 0x392   : > { %v902_v27 = vpop.f32.mrf.mxu2 }
 0x393   : > { %v906_v28 = vpack.c.bf16 %v902_v27, %v902_v27 }
 0x395   : > { %1502 = vmatmul.msk.bf16.vlgmr.msrb.gmra.mxu3 %vm787_vm2, %v906_v28  ;;  %v1566_v28 = vld [vmem:[%s2377_s21 + $0x18] sm:$0xff] }
 0x396   : > { %1178 = vmatpush.bf16.msrb.mxu3 %v1562_v17  ;;  %1259 = vmatpush.bf16.msrb.mxu0 %v1566_v28 }
 0x39a   : > { %v904_v29 = vpop.f32.mrf.mxu2  ;;  %v942_v30 = vpop.f32.mrf.mxu0  ;;  %1179 = vmatpush.bf16.msrb.mxu3 %v1561_v18 }
 0x3a2   : > { %v944_v32 = vpop.f32.mrf.mxu0 }
 0x3a3   : > { %v1565_v32 = vld [vmem:[%s2377_s21 + $0x10] sm:$0xff] }
 0x3a4   : > { %1260 = vmatpush.bf16.msrb.mxu0 %v1565_v32 }
 0x3aa   : > { %v1043_v33 = vpop.f32.mrf.mxu0 }
 0x3ab   : > { %v1044_v34 = vadd.f32 %v1043_v33, %v2170_v31 }
 0x3ad   : > { %v1047_v35 = vsel %vm787_vm2, %v1044_v34, -inf }
 0x3ae   : > { %1048 = vmax.xlane.f32.xlu0 %v1047_v35  ;;  %v1637_v35 = vld [vmem:[%s2378_s12] ss:$0 sm:$0xff]  ;;  %s2382_s12 = sld [smem:[#allocation26_spill]] }
 0x3b2   : > { %v998_v36 = vpop.f32.mrf.mxu2  ;;  %v1045_v37 = vpop.f32.mrf.mxu0 }
 0x3b3   : > { %v1002_v38 = vpack.c.bf16 %v998_v36, %v998_v36  ;;  %v1638_v37 = vld [vmem:[%s2379_s1] ss:$0 sm:$0xff]  ;;  %s2383_s1 = sld [smem:[#allocation32_spill]] }
 0x3b5   : > { %1506 = vmatmul.msk.bf16.vlgmr.msra.gmra.mxu3 %vm787_vm2, %v1002_v38 }
 0x3b9   : > { %s1313_s23 = scalar_lea.hbm %s2383_s1, %s1552_s9  ;;  %s1805_s18 = scalar_lea.hbm %s2383_s1, 16 }
 0x3ba   : > { %v1000_v39 = vpop.f32.mrf.mxu2 }
 0x418   : > { %v923_v40 = vpop.f32.mrf.mxu3 }
 0x419   : > { %v943_v31 = vadd.f32 %v942_v30, %v923_v40 }
 0x420   : > { %v925_v41 = vpop.f32.mrf.mxu3 }
 0x421   : > { %v1049_v42 = vpop.xlane.xlu0 %1048 }
 0x422   : > { %v1050_v43 = vsub.f32 %v1044_v34, %v1049_v42  ;;  %v1564_v42 = vld [vmem:[%s2377_s21 + $0x8] sm:$0xff] }
 0x423   : > { %1261 = vmatpush.bf16.msrb.mxu0 %v1564_v42 }
 0x424   : > { %v1051_v44 = vmul.f32 1.442695, %v1050_v43  ;;  %v1563_v43 = vld [vmem:[%s2377_s21] sm:$0xff] }
 0x426   : > { %1655 = vpow2.f32 %v1051_v44  ;;  %v1639_v44 = vld [vmem:[%s2380_s24] ss:$0 sm:$0xff]  ;;  %s1317_s24 = sshll.u32 %s1313_s23, 4  ;;  %s1318_s24 = int_to_ptr.hbm [resolvable:$true] %s1317_s24 }
 0x427   : > { %1262 = vmatpush.bf16.msrb.mxu0 %v1563_v43  ;;  %s1799_s26 = sshra.s32 %s1318_s24, 4  ;;  %s1800_s26 = int_to_ptr.hbm [resolvable:$true] %s1799_s26 }
 0x428   : > { %p1806_p3 = scmp.lt.s32.totalorder %s1800_s26, %s2383_s1 }
 0x42c   : > { %v1656_v45 = vpop.eup %1655 }
 0x42d   : > { %v1053_v46 = vsel %vm787_vm2, %v1656_v45, 0.0 }
 0x42e   : > { %1054 = vadd.xlane.f32.xlu0 %v1053_v46 }
 0x438   : > { %v1019_v47 = vpop.f32.mrf.mxu3 }
 0x439   : > { %v1023_v48 = vadd.f32 %v1019_v47, %v943_v31 }
 0x440   : > { %v1021_v49 = vpop.f32.mrf.mxu3 }
 0x441   : > { %v1640_v49 = vld [vmem:[%s2381_s17] ss:$0 sm:$0xff]  ;;  %s1801_s17 = scalar_lea.hbm %s1800_s26, 8 }
 0x442   : > { %1059 = vrot.lane.b32.xlu0 %v884_v5, %s1863_s14  ;;  %v1864_v5 = vmov 32.0   ;;  %p1802_p6 = scmp.ne.s32.totalorder %s1800_s26, %s1801_s17  ;;  %p1807_p4 = scmp.lt.s32.totalorder %s1805_s18, %s1801_s17 }
 0x444   : > { %p1803_p13 = pnand %p1802_p6, %p2001_p11  ;;  %p1808_p5 = por %p1807_p4, %p1806_p3 }
 0x446   : > { %p1804_p2 = pneg %p1803_p13 }
 0x448   : > { %p1809_p7 = pnand %p1808_p5, %p1804_p2 }
 0x4a1   : > { %v1055_v50 = vpop.xlane.xlu0 %1054 }
 0x4a2   : > { %1657 = vrcp.f32 %v1055_v50 }
 0x4a3   : > { %1659 = vrcp.f32 %v1864_v5  ;;  %v1641_v5 = vld [vmem:[%s2382_s12] ss:$0 sm:$0xff] }
 0x4a8   : > { %v1658_v51 = vpop.eup %1657 }
 0x4a9   : > { %v1057_v52 = vmul.f32 %v1658_v51, %v1656_v45  ;;  %v1660_v7 = vpop.eup %1659 }
 0x4aa   : > { %v1113_v8 = vmul.f32 32.0, %v1660_v7  ;;  %vm1117_vm3 = vweird.f32 %v1660_v7 }
 0x4ab   : > { %v1058_v55 = vpack.c.bf16 %v1057_v52, %v1057_v52 }
 0x4ac   : > { %v1114_v9 = vsub.f32 1.0, %v1113_v8 }
 0x4ae   : > { %v1115_v11 = vmul.f32 %v1660_v7, %v1114_v9  ;;  %v1642_v9 = vld [vmem:[%s2385_s30] ss:$0 sm:$0xff] }
 0x4b0   : > { %v1116_v12 = vadd.f32 %v1660_v7, %v1115_v11 }
 0x4b2   : > { %v2224_v13 = vsel %vm1117_vm3, %v1660_v7, %v1116_v12 }
 0x4b4   : > { %v1060_v53 = vpop.permute.xlu0 %1059 }
 0x4b5   : > { %v1065_v54 = vsel %vm822_vm1, %v1060_v53, 0 }
 0x4b6   : > { %1074 = vmatpush.bf16.msra.mxu1 %v1065_v54 }
 0x4b9   : > { %1508 = vmatmul.msk.bf16.vlgmr.msra.gmra.mxu1 %vm787_vm2, %v1058_v55 }
 0x536   : > { %v1076_v58 = vpop.f32.mrf.mxu1 }
 0x537   : > { %v1080_v59 = vpack.c.bf16 %v1076_v58, %v1076_v58 }
 0x539   : > { %1509 = vmatmul.msk.bf16.vlgmr.msrb.gmra.mxu2 %vm787_vm2, %v1080_v59 }
 0x53e   : > { %v1078_v60 = vpop.f32.mrf.mxu1 }
 0x5bc   : > { %v1097_v62 = vpop.f32.mrf.mxu2 }
 0x5bd   : > { %v1101_v0 = vadd.f32 %v1097_v62, %v1023_v48 }
 0x5bf   : > { %v1106_v1 = vadd.f32 %v1636_v61, %v1101_v0 }
 0x5c1   : > { %v1108_v2 = vadd.f32 %v1107_v63, %v1106_v1 }
 0x5c3   : > { %v1109_v3 = vsel %vm700_vm0, %v1108_v2, 0.0 }
 0x5c4   : > { %1110 = vadd.xlane.f32.xlu2 %v1109_v3  ;;  %v1099_v4 = vpop.f32.mrf.mxu2 }
 0x637   : > { %v1111_v14 = vpop.xlane.xlu2 %1110 }
 0x638   : > { %v1119_v6 = vmul.f32 %v2224_v13, %v1111_v14 }
 0x63a   : > { %v1120_v10 = vsub.f32 %v1108_v2, %v1119_v6 }
 0x63c   : > { %v1121_v15 = vmul.f32 %v1120_v10, %v1120_v10 }
 0x63e   : > { %v1122_v16 = vsel %vm700_vm0, %v1121_v15, 0.0 }
 0x63f   : > { %1123 = vadd.xlane.f32.xlu1 %v1122_v16 }
 0x6b2   : > { %v1124_v20 = vpop.xlane.xlu1 %1123 }
 0x6b3   : > { %v1125_v21 = vmul.f32 %v1124_v20, %v2224_v13 }
 0x6b5   : > { %v1126_v23 = vadd.f32 1e-05, %v1125_v21 }
 0x6b7   : > { %1661 = vrsqrt.f32 %v1126_v23  ;;  %vm1133_vm5 = vweird.f32 %v1126_v23 }
 0x6bd   : > { %v1662_v26 = vpop.eup %1661 }
 0x6be   : > { %v1128_v27 = vmul.f32 %v1662_v26, %v1126_v23  ;;  %vm1134_vm4 = vweird.f32 %v1662_v26 }
 0x6bf   : > { %vm1135_vm6 = vmor %vm1133_vm5, %vm1134_vm4 }
 0x6c0   : > { %v1129_v29 = vmul.f32 %v1662_v26, %v1128_v27 }
 0x6c2   : > { %v1130_v30 = vmul.f32 0.5, %v1129_v29 }
 0x6c4   : > { %v1131_v33 = vsub.f32 1.5, %v1130_v30 }
 0x6c6   : > { %v1132_v34 = vmul.f32 %v1662_v26, %v1131_v33 }
 0x6c8   : > { %v1136_v36 = vsel %vm1135_vm6, %v1662_v26, %v1132_v34 }
 0x6c9   : > { %v1137_v38 = vmul.f32 %v1136_v36, %v1120_v10 }
 0x6cb   : > { %v1142_v39 = vmul.f32 %v1637_v35, %v1137_v38 }
 0x6cd   : > { %v1147_v40 = vadd.f32 %v1638_v37, %v1142_v39 }
 0x6cf   : > { %v1148_v41 = vpack.c.bf16 %v1147_v40, %v1147_v40 }
 0x6d1   : > { %1518 = vmatmul.msk.bf16.vlgmr.msrb.gmra.mxu3 %vm700_vm0, %v1148_v41 }
 0x754   : > { %v1181_v45 = vpop.f32.mrf.mxu3 }
 0x755   : > { %v1182_v46 = vadd.f32 %v1639_v44, %v1181_v45 }
 0x757   : > { %v1185_v31 = vmax.f32 %v1182_v46, 0.0 }
 0x759   : > { %v1186_v47 = vpack.c.bf16 %v1185_v31, %v1185_v31 }
 0x75b   : > { %1263 = vmatmul.bf16.vlgmr.msrb.gmra.mxu0 %v1186_v47 }
 0x75c   : > { %v1183_v48 = vpop.f32.mrf.mxu3 }
 0x7d8   : > { %v1264_v50 = vpop.f32.mrf.mxu0 }
 0x7d9   : > { %v1265_v51 = vadd.f32 %v1640_v49, %v1264_v50 }
 0x7db   : > { %v1268_v52 = vadd.f32 %v1265_v51, %v1147_v40 }
 0x7dd   : > { %v1269_v53 = vsel %vm700_vm0, %v1268_v52, 0.0 }
 0x7de   : > { %1270 = vadd.xlane.f32.xlu0 %v1269_v53 }
 0x7e0   : > { %v1266_v54 = vpop.f32.mrf.mxu0 }
 0x851   : > { %v1271_v55 = vpop.xlane.xlu0 %1270 }
 0x852   : > { %v1272_v56 = vmul.f32 %v1271_v55, %v2224_v13 }
 0x854   : > { %v1273_v57 = vsub.f32 %v1268_v52, %v1272_v56 }
 0x856   : > { %v1274_v58 = vmul.f32 %v1273_v57, %v1273_v57 }
 0x858   : > { %v1275_v59 = vsel %vm700_vm0, %v1274_v58, 0.0 }
 0x859   : > { %1276 = vadd.xlane.f32.xlu2 %v1275_v59 }
 0x8cc   : > { %v1277_v60 = vpop.xlane.xlu2 %1276 }
 0x8cd   : > { %v1278_v61 = vmul.f32 %v1277_v60, %v2224_v13 }
 0x8cf   : > { %v1279_v62 = vadd.f32 1e-05, %v1278_v61 }
 0x8d1   : > { %1663 = vrsqrt.f32 %v1279_v62  ;;  %vm1286_vm8 = vweird.f32 %v1279_v62 }
 0x8d7   : > { %v1664_v63 = vpop.eup %1663 }
 0x8d8   : > { %v1281_v0 = vmul.f32 %v1664_v63, %v1279_v62  ;;  %vm1287_vm7 = vweird.f32 %v1664_v63 }
 0x8d9   : > { %vm1288_vm9 = vmor %vm1286_vm8, %vm1287_vm7 }
 0x8da   : > { %v1282_v1 = vmul.f32 %v1664_v63, %v1281_v0 }
 0x8dc   : > { %v1283_v2 = vmul.f32 0.5, %v1282_v1 }
 0x8de   : > { %v1284_v3 = vsub.f32 1.5, %v1283_v2 }
 0x8e0   : > { %v1285_v4 = vmul.f32 %v1664_v63, %v1284_v3 }
 0x8e2   : > { %v1289_v7 = vsel %vm1288_vm9, %v1664_v63, %v1285_v4 }
 0x8e3   : > { %v1290_v8 = vmul.f32 %v1289_v7, %v1273_v57 }
 0x8e5   : > { %v1295_v11 = vmul.f32 %v1641_v5, %v1290_v8 }
 0x8e7   : > { %v1300_v12 = vadd.f32 %v1642_v9, %v1295_v11 }
 0x8e9   : > { %1301 = vst.msk [vmem:[%s679_s28] sm:$0xff] %vm700_vm0, %v1300_v12 }
 0x8ea   : > { %1812 = shalt.err (!%p1809_p7)
}
 0x8eb   : > { %1579 = dma.vmem_to_hbm [thread:$0]  (%p2001_p11), %s1316_s27, 128, %s1318_s24, %s1303_s19  }
 0x8ec PF: > { %s2386_s22 = sld [smem:[#allocation15_spill]]  ;;  %p1595_p0 = pnand %p1456_p9, %p2005_p12 }
 0x8ee   : > { %p1596_p8 = pneg %p1595_p0 }
 0x8f2   : > { %s1329_s23 = sand.u32 1, %s2386_s22  }
 0x8f3   : > { %s1330_s29 = scalar_lea.sflag [#allocation4], %s1329_s23 }
 0x8f4   : > { %1842 = dma.done.wait (%p1596_p8), %s1330_s29, 128  }
 0x8f5   : > { %1844 = vsyncadd (%p1596_p8), %s1330_s29, 4294967168  ;;  %s2389_s27 = sld [smem:[#allocation18_spill]]  ;;  %s2392_s24 = smov %s1851_s25 }
 0x8f6   : > { %s2390_s14 = sld [smem:[#allocation16_spill]] }
 0x8f7   : > { %s2391_s26 = sld [smem:[#allocation19_spill]] }
 0x8fb   : > { %p36_p10 = scmp.ge.s32.totalorder %s2389_s27, 4  }
 0x8fc   : > { %s2393_s25 = smov %s2390_s14 }
 0x8fd   :  { %38 = sbr.rel (!%p36_p10) target bundleno = 21 (0x15), region = 170 }
 0x902   :  { %1336 = vsyncpa [#allocation3], 1 }
 0x903   :  { %1338 = vsyncpa [#allocation3 + $0x1], 1 }
 0x904   :  { %1339 = vsyncpa [#allocation6], 1 }
 0x905   :  { %1341 = vsyncpa [#allocation6 + $0x1], 1 }
 0x906   :  { %1342 = vsyncpa [#allocation9], 1 }
 0x907   :  { %1344 = vsyncpa [#allocation9 + $0x1], 1 }
 0x908   :  { %1345 = vsyncpa [#allocation4], 1 }
 0x909   :  { %1347 = vsyncpa [#allocation4 + $0x1], 1 }

// kernel: tpu_custom_call.1
= control target key start
LH: loop header
LB: loop body
LE: loop exit
PB: predicated region body
PF: predicated region fallthrough
CT: control target
= control target key end

     0   :  { %s2317_s0 = inlined_call_operand.hbm [shape: bf16[2,8,32], index: 0, kind: input, shape index: {}]   ;;  %s2318_s1 = inlined_call_operand.hbm [shape: bf16[2,8,32], index: 1, kind: input, shape index: {}]   ;;  %s2319_s2 = inlined_call_operand.hbm [shape: bf16[2,8,32], index: 2, kind: input, shape index: {}]   ;;  %s2320_s3 = inlined_call_operand.hbm [shape: bf16[2,8,8], index: 3, kind: input, shape index: {}]   ;;  %s2321_s4 = inlined_call_operand.vmem [shape: bf16[32,32], index: 4, kind: input, shape index: {}]   ;;  %s2322_s5 = inlined_call_operand.vmem [shape: bf16[32,32], index: 5, kind: input, shape index: {}]   ;;  %s2323_s6 = inlined_call_operand.vmem [shape: bf16[32,32], index: 6, kind: input, shape index: {}]   ;;  %s2324_s7 = inlined_call_operand.vmem [shape: bf16[32,32], index: 7, kind: input, shape index: {}]   ;;  %s2325_s8 = inlined_call_operand.vmem [shape: f32[1,32], index: 8, kind: input, shape index: {}]   ;;  %s2326_s9 = inlined_call_operand.vmem [shape: f32[1,32], index: 9, kind: input, shape index: {}]   ;;  %s2327_s10 = inlined_call_operand.vmem [shape: f32[1,32], index: 10, kind: input, shape index: {}]   ;;  %s2328_s11 = inlined_call_operand.vmem [shape: f32[1,32], index: 11, kind: input, shape index: {}]   ;;  %s2329_s12 = inlined_call_operand.vmem [shape: f32[1,32], index: 12, kind: input, shape index: {}]   ;;  %s2330_s13 = inlined_call_operand.vmem [shape: bf16[32,128], index: 13, kind: input, shape index: {}]   ;;  %s2331_s14 = inlined_call_operand.vmem [shape: f32[1,128], index: 14, kind: input, shape index: {}]   ;;  %s2332_s15 = inlined_call_operand.vmem [shape: bf16[128,32], index: 15, kind: input, shape index: {}]   ;;  %s2333_s16 = inlined_call_operand.vmem [shape: f32[1,32], index: 16, kind: input, shape index: {}]   ;;  %s2334_s17 = inlined_call_operand.hbm [shape: f32[2,8,32], index: 17, kind: output, shape index: {}]  }
   0x1   :  { %2349 = sst [smem:[#allocation22_spill]] %s2317_s0 }
   0x2   :  { %2350 = sst [smem:[#allocation23_spill]] %s2318_s1 }
   0x3   :  { %2351 = sst [smem:[#allocation24_spill]] %s2326_s9 }
   0x4   :  { %2352 = sst [smem:[#allocation25_spill]] %s2327_s10 }
   0x5   :  { %2353 = sst [smem:[#allocation26_spill]] %s2328_s11 }
   0x6   :  { %2354 = sst [smem:[#allocation27_spill]] %s2329_s12 }
   0x7   :  { %2355 = sst [smem:[#allocation28_spill]] %s2330_s13 }
   0x8   :  { %2356 = sst [smem:[#allocation29_spill]] %s2331_s14 }
   0x9   :  { %2357 = sst [smem:[#allocation30_spill]] %s2332_s15 }
   0xa   :  { %2358 = sst [smem:[#allocation31_spill]] %s2333_s16 }
   0xb   :  { %2359 = sst [smem:[#allocation32_spill]] %s2334_s17 }
   0xc   :  { %22 = vsyncpa [#allocation3], 0 }
   0xd   :  { %24 = vsyncpa [#allocation3 + $0x1], 0 }
   0xe   :  { %25 = vsyncpa [#allocation6], 0 }
   0xf   :  { %27 = vsyncpa [#allocation6 + $0x1], 0 }
  0x10   :  { %28 = vsyncpa [#allocation9], 0 }
  0x11   :  { %30 = vsyncpa [#allocation9 + $0x1], 0 }
  0x12   :  { %31 = vsyncpa [#allocation4], 0 }
  0x13   :  { %33 = vsyncpa [#allocation4 + $0x1], 0  ;;  %s1955_s24 = smov 0   ;;  %s1957_s25 = smov 0  }
  0x14   :  { %s1959_s26 = smov 0   ;;  %s1961_s27 = smov 0  }
  0x15 LB: > { %2360 = sst [smem:[#allocation15_spill]] %s1847_s24  ;;  %s1976_s28 = sadd.s32 4294967295, %s1859_s27   ;;  %s1859_s27 = sphi %s1961_s27, %s2389_s27   ;;  %s1855_s26 = sphi %s1959_s26, %s2391_s26   ;;  %s1851_s25 = sphi %s1957_s25, %s2393_s25   ;;  %s1847_s24 = sphi %s1955_s24, %s2392_s24  }
  0x16   : > { %2361 = sst [smem:[#allocation16_spill]] %s1855_s26  ;;  %s1454_s29 = sadd.s32 4294967294, %s1859_s27  }
  0x17   : > { %2362 = sst [smem:[#allocation17_spill]] %s1859_s27  ;;  %s1980_s0 = sadd.s32 1, %s1859_s27  }
  0x18   : > { %2363 = sst [smem:[#allocation18_spill]] %s1980_s0  ;;  %s46_s30 = sadd.s32 1, %s1855_s26 }
  0x19   : > { %s43_s18 = ssub.s32 %s1859_s27, %s1980_s0  ;;  %p53_p0 = scmp.ne.s32.totalorder %s1855_s26, %s1851_s25 }
  0x1a   : > { %p44_p1 = scmp.eq.s32.totalorder %s43_s18, 0  ;;  %p54_p2 = scmp.eq.s32.totalorder %s1859_s27, 0 }
  0x1b   : > { %p59_p3 = scmp.ne.s32.totalorder %s1851_s25, %s1847_s24  ;;  %p60_p4 = scmp.eq.s32.totalorder %s1976_s28, 0 }
  0x1c   : > { %s1992_s19 = scalar_select %p44_p1, %s1855_s26, %s46_s30  }
  0x1d   : > { %p55_p5 = por %p54_p2, %p53_p0  ;;  %p1994_p6 = por %p60_p4, %p59_p3 }
  0x1e   : > { %2364 = sst [smem:[#allocation19_spill]] %s1992_s19  ;;  %p434_p7 = scmp.eq.s32.totalorder %s1976_s28, 1 }
  0x1f   : > { %p440_p8 = scmp.eq.s32.totalorder %s1454_s29, 1  ;;  %p1456_p9 = scmp.ge.s32.totalorder %s1859_s27, 2 }
  0x20   : > { %p1598_p10 = scmp.lt.s32.totalorder %s1859_s27, 2  ;;  %p2001_p11 = por %p434_p7, %p53_p0 }
  0x21   : > { %p2005_p12 = por %p440_p8, %p59_p3  ;;  %s2010_s22 = sand.u32 1, %s1855_s26  }
  0x22   : > { %s2366_s20 = scalar_select %p2001_p11, 1, 0 }
  0x23   : > { %s2368_s21 = scalar_select %p2005_p12, 1, 0 }
  0x24   : > { %2367 = sst [smem:[#allocation20_spill]] %s2366_s20  ;;  %s2013_s23 = sshll.u32 %s1859_s27, 2 }
  0x25   : > { %2369 = sst [smem:[#allocation21_spill]] %s2368_s21  ;;  %s2016_s30 = sshll.u32 %s2010_s22, 2 }
  0x26   : > { %p2018_p13 = pnand %p1598_p10, %p55_p5  ;;  %s518_s18 = sand.u32 1, %s1859_s27  }
  0x27   : > { %s2371_s24 = sld [smem:[#allocation23_spill]]  ;;  %s522_s26 = scalar_lea.vmem [#allocation5], %s2016_s30 }
  0x28   : > { %s530_s20 = sshll.u32 %s522_s26, 4  ;;  %p1465_p0 = scmp.ge.s32.totalorder %s1859_s27, 1  ;;  %s531_s20 = int_to_ptr.vmem [resolvable:$true] %s530_s20 }
  0x29   : > { %s2029_s11 = scalar_lea.sflag [#allocation6], %s518_s18  ;;  %p1669_p2 = pneg %p2018_p13 }
  0x2d   : > { %s2372_s12 = smov %s2371_s24  ;;  %s526_s21 = scalar_lea.hbm %s2371_s24, %s2013_s23 }
  0x2e   : > { %s528_s17 = sshll.u32 %s526_s21, 4  ;;  %s1672_s26 = scalar_lea.hbm %s2372_s12, 8  ;;  %s529_s17 = int_to_ptr.hbm [resolvable:$true] %s528_s17 }
  0x2f   : > { %s1665_s16 = sshra.s32 %s529_s17, 4  ;;  %s1666_s16 = int_to_ptr.hbm [resolvable:$true] %s1665_s16 }
  0x30   : > { %s1667_s14 = scalar_lea.hbm %s1666_s16, 4  ;;  %p1673_p5 = scmp.lt.s32.totalorder %s1666_s16, %s2372_s12 }
  0x31   : > { %p1668_p1 = scmp.ne.s32.totalorder %s1666_s16, %s1667_s14  ;;  %p1674_p7 = scmp.lt.s32.totalorder %s1672_s26, %s1667_s14 }
  0x33   : > { %p1670_p3 = pnand %p1669_p2, %p1668_p1  ;;  %p1675_p8 = por %p1674_p7, %p1673_p5 }
  0x35   : > { %p1671_p4 = pneg %p1670_p3 }
  0x37   : > { %p1676_p10 = pnand %p1675_p8, %p1671_p4 }
  0x39   : > { %1679 = shalt.err (!%p1676_p10)
}
  0x3a   : > { %1587 = dma.hbm_to_vmem [thread:$0]  (!%p2018_p13), %s529_s17, 64, %s531_s20, %s2029_s11  }
  0x3b   : > { %p573_p1 = scmp.lt.s32.totalorder %s1859_s27, 3  ;;  %s2373_s24 = sld [smem:[#allocation22_spill]] }
  0x3c   : > { %s503_s26 = scalar_lea.vmem [#allocation2], %s2016_s30  ;;  %s500_s12 = scalar_lea.sflag [#allocation3], %s2010_s22 }
  0x3d   : > { %p2052_p3 = pnand %p1465_p0, %p573_p1  ;;  %s511_s21 = sshll.u32 %s503_s26, 4  ;;  %s512_s21 = int_to_ptr.vmem [resolvable:$true] %s511_s21 }
  0x41   : > { %s2374_s10 = smov %s2373_s24  ;;  %s507_s19 = scalar_lea.hbm %s2373_s24, %s2013_s23 }
  0x42   : > { %s509_s16 = sshll.u32 %s507_s19, 4  ;;  %s1702_s18 = scalar_lea.hbm %s2374_s10, 8  ;;  %s510_s16 = int_to_ptr.hbm [resolvable:$true] %s509_s16 }
  0x43   : > { %s1695_s9 = sshra.s32 %s510_s16, 4  ;;  %s1696_s9 = int_to_ptr.hbm [resolvable:$true] %s1695_s9 }
  0x44   : > { %s1697_s15 = scalar_lea.hbm %s1696_s9, 4  ;;  %p1703_p0 = scmp.lt.s32.totalorder %s1696_s9, %s2374_s10 }
  0x45   : > { %p1698_p4 = scmp.ne.s32.totalorder %s1696_s9, %s1697_s15  ;;  %p1704_p8 = scmp.lt.s32.totalorder %s1702_s18, %s1697_s15 }
  0x47   : > { %p1700_p5 = pnand %p1698_p4, %p1669_p2  ;;  %p1705_p10 = por %p1704_p8, %p1703_p0 }
  0x49   : > { %p1701_p7 = pneg %p1700_p5 }
  0x4b   : > { %p1706_p1 = pnand %p1705_p10, %p1701_p7 }
  0x4d   : > { %1709 = shalt.err (!%p1706_p1)
}
  0x4e   : > { %1584 = dma.hbm_to_vmem [thread:$0]  (!%p2018_p13), %s510_s16, 64, %s512_s21, %s500_s12  }
  0x4f   : > { %s545_s27 = scalar_lea.hbm %s2319_s2, %s2013_s23  ;;  %s541_s17 = scalar_lea.vmem [#allocation7], %s2016_s30 }
  0x50   : > { %s549_s20 = sshll.u32 %s541_s17, 4  ;;  %s547_s13 = sshll.u32 %s545_s27, 4  ;;  %s550_s20 = int_to_ptr.vmem [resolvable:$true] %s549_s20  ;;  %s548_s13 = int_to_ptr.hbm [resolvable:$true] %s547_s13 }
  0x51   : > { %s1725_s9 = sshra.s32 %s548_s13, 4  ;;  %s1732_s12 = scalar_lea.hbm %s2319_s2, 8  ;;  %s1726_s9 = int_to_ptr.hbm [resolvable:$true] %s1725_s9 }
  0x52   : > { %s1727_s15 = scalar_lea.hbm %s1726_s9, 4  ;;  %p1733_p0 = scmp.lt.s32.totalorder %s1726_s9, %s2319_s2 }
  0x53   : > { %p1728_p4 = scmp.ne.s32.totalorder %s1726_s9, %s1727_s15  ;;  %p1734_p8 = scmp.lt.s32.totalorder %s1732_s12, %s1727_s15 }
  0x55   : > { %p1730_p5 = pnand %p1728_p4, %p1669_p2  ;;  %p1735_p10 = por %p1734_p8, %p1733_p0 }
  0x57   : > { %p1731_p7 = pneg %p1730_p5 }
  0x59   : > { %p1736_p1 = pnand %p1735_p10, %p1731_p7 }
  0x5b   : > { %1739 = shalt.err (!%p1736_p1)
}
  0x5c   : > { %1590 = dma.hbm_to_vmem [thread:$0]  (!%p2018_p13), %s548_s13, 64, %s550_s20, %s2029_s11  }
  0x5d   : > { %s564_s19 = scalar_lea.hbm %s2320_s3, %s2013_s23  ;;  %s560_s17 = scalar_lea.vmem [#allocation8], %s2016_s30 }
  0x5e   : > { %s566_s26 = sshll.u32 %s564_s19, 4  ;;  %s568_s18 = sshll.u32 %s560_s17, 4  ;;  %s567_s26 = int_to_ptr.hbm [resolvable:$true] %s566_s26  ;;  %s569_s18 = int_to_ptr.vmem [resolvable:$true] %s568_s18 }
  0x5f   : > { %s557_s9 = scalar_lea.sflag [#allocation9], %s2010_s22  ;;  %s1755_s15 = sshra.s32 %s567_s26, 4  ;;  %s1756_s15 = int_to_ptr.hbm [resolvable:$true] %s1755_s15 }
  0x60   : > { %s1757_s0 = scalar_lea.hbm %s1756_s15, 4  ;;  %s1762_s13 = scalar_lea.hbm %s2320_s3, 8 }
  0x61   : > { %p1758_p4 = scmp.ne.s32.totalorder %s1756_s15, %s1757_s0  ;;  %p1763_p0 = scmp.lt.s32.totalorder %s1756_s15, %s2320_s3 }
  0x62   : > { %p1764_p8 = scmp.lt.s32.totalorder %s1762_s13, %s1757_s0 }
  0x63   : > { %p1760_p5 = pnand %p1758_p4, %p1669_p2 }
  0x64   : > { %p1765_p10 = por %p1764_p8, %p1763_p0 }
  0x65   : > { %p1761_p7 = pneg %p1760_p5 }
  0x67   : > { %p1766_p1 = pnand %p1765_p10, %p1761_p7 }
  0x69   : > { %1769 = shalt.err (!%p1766_p1)
}
  0x6a   : > { %1593 = dma.hbm_to_vmem [thread:$0]  (!%p2018_p13), %s567_s26, 64, %s569_s18, %s557_s9  }
  0x6b   : > { %577 = sbr.rel (%p2052_p3) target bundleno = 2284 (0x8ec), region = 88  ;;  %s2106_s22 = sand.u32 (!%p2052_p3), 1, %s1851_s25  }
  0x6c   : > { %s2109_s30 = sshll.u32 (!%p2052_p3), %s2106_s22, 2  ;;  %s580_s16 = scalar_lea.sflag (!%p2052_p3), [#allocation3], %s2106_s22 }
  0x6d   : > { %s583_s21 = scalar_lea.vmem (!%p2052_p3), [#allocation2], %s2109_s30 }
  0x70   : > { %1830 = dma.done.wait (%p1994_p6), %s580_s16, 64  }
  0x71   : > { %1832 = vsyncadd (%p1994_p6), %s580_s16, 4294967232  ;;  %s589_s29 = sand.u32 1, %s1976_s28   ;;  %s593_s27 = scalar_lea.vmem [#allocation5], %s2109_s30 }
  0x72   : > { %s590_s14 = scalar_lea.sflag [#allocation6], %s589_s29 }
  0x73   : > { %1834 = dma.done.wait (%p1994_p6), %s590_s14, 128  }
  0x74   : > { %1836 = vsyncadd (%p1994_p6), %s590_s14, 4294967168  ;;  %s603_s24 = scalar_lea.vmem [#allocation7], %s2109_s30  ;;  %s610_s19 = scalar_lea.sflag [#allocation9], %s2106_s22 }
  0x75   : > { %s613_s26 = scalar_lea.vmem [#allocation8], %s2109_s30 }
  0x76   : > { %1838 = dma.done.wait (%p1994_p6), %s610_s19, 64  }
  0x77   : > { %1840 = vsyncadd (%p1994_p6), %s610_s19, 4294967232  ;;  %v1556_v0 = vld [vmem:[%s2321_s4 + $0x8] sm:$0xff]  ;;  %v1555_v2 = vld [vmem:[%s2321_s4] sm:$0xff]  ;;  %vm700_vm0 = vcmask 261120   ;;  %vm822_vm1 = vcmask 1043456   ;;  %vm787_vm2 = vcmask 64512  }
  0x78   : > { %v1560_v1 = vld [vmem:[%s2323_s6 + $0x8] sm:$0xff]  ;;  %710 = vmatpush.bf16.msra.mxu1 %v1556_v0  ;;  %v1559_v3 = vld [vmem:[%s2323_s6] sm:$0xff]  ;;  %v2145_v6 = vld [vmem:[%s603_s24] sm:$0xf]  ;;  %s1862_s29 = smov 120   ;;  %s1863_s14 = smov 104  }
  0x79   : > { %v1558_v4 = vld [vmem:[%s2322_s5 + $0x8] sm:$0xff]  ;;  %776 = vmatpush.bf16.msra.mxu2 %v1560_v1  ;;  %v1557_v7 = vld [vmem:[%s2322_s5] sm:$0xff]  ;;  %v785_v30 = vld [vmem:[%s613_s26] sm:$0xf]  ;;  %s2376_s13 = sld [smem:[#allocation28_spill]]  ;;  %s1470_s18 = sshll.u32 %s2106_s22, 3 }
  0x7a   : > { %v682_v5 = vld [vmem:[%s593_s27] sm:$0xf]  ;;  %v681_v8 = vld [vmem:[%s583_s21] sm:$0xf]  ;;  %s1861_s21 = smov 112   ;;  %v2170_v31 = vunpack.c.l.bf16 %v785_v30  ;;  %s2378_s12 = sld [smem:[#allocation24_spill]] }
  0x7b   : > { %v840_v52 = vld [vmem:[%s2324_s7] sm:$0xf]  ;;  %s2379_s1 = sld [smem:[#allocation25_spill]]  ;;  %s1552_s9 = sshll.u32 %s1976_s28, 3 }
  0x7c   : > { %711 = vmatpush.bf16.msra.mxu1 %v1555_v2  ;;  %v931_v53 = vsel %vm822_vm1, %v840_v52, 0  ;;  %s2380_s24 = sld [smem:[#allocation29_spill]]  ;;  %s679_s28 = scalar_lea.vmem [#allocation10], %s1470_s18 }
  0x7d   : > { %777 = vmatpush.bf16.msra.mxu2 %v1559_v3  ;;  %s2381_s17 = sld [smem:[#allocation31_spill]]  ;;  %s1315_s27 = sshll.u32 %s679_s28, 4  ;;  %s1316_s27 = int_to_ptr.vmem [resolvable:$true] %s1315_s27 }
  0x7e   : > { %s2385_s30 = sld [smem:[#allocation27_spill]]  ;;  %s1303_s19 = scalar_lea.sflag [#allocation4], %s2106_s22 }
  0x7f   : > { %1479 = vmatmul.msk.bf16.vlgmr.msra.gmra.mxu1 %vm700_vm0, %v682_v5 }
  0x80   : > { %743 = vmatpush.bf16.msrb.mxu1 %v1558_v4  ;;  %1497 = vmatmul.msk.bf16.vlgmr.msra.gmra.mxu2 %vm700_vm0, %v2145_v6 }
  0x84   : > { %744 = vmatpush.bf16.msrb.mxu1 %v1557_v7 }
  0x8f   : > { %1488 = vmatmul.msk.bf16.vlgmr.msrb.gmra.mxu1 %vm700_vm0, %v681_v8 }
  0xfc   : > { %v713_v9 = vpop.f32.mrf.mxu1 }
  0xfd   : > { %v2154_v10 = vpack.c.bf16 %v713_v9, %v713_v9 }
  0xff   : > { %v824_v11 = vsel %vm822_vm1, %v2154_v10, 0  ;;  %v883_v3 = vunpack.c.l.b16 %v2154_v10 }
 0x100   : > { %833 = vmatpush.bf16.msra.mxu0 %v824_v11 }
 0x101   : > { %v884_v5 = vpack.c.b16 %v883_v3, %v883_v3 }
 0x103   : > { %v779_v12 = vpop.f32.mrf.mxu2 }
 0x104   : > { %v715_v13 = vpop.f32.mrf.mxu1  ;;  %v783_v14 = vmul.f32 0.17677669, %v779_v12  ;;  %940 = vmatpush.bf16.msrb.mxu0 %v931_v53 }
 0x106   : > { %v784_v18 = vpack.c.bf16 %v783_v14, %v783_v14 }
 0x108   : > { %v842_v22 = vunpack.c.l.b16 %v784_v18 }
 0x10a   : > { %v843_v24 = vpack.c.b16 %v842_v22, %v842_v22 }
 0x10b   : > { %v781_v15 = vpop.f32.mrf.mxu2 }
 0x10c   : > { %v746_v16 = vpop.f32.mrf.mxu1 }
 0x10d   : > { %v750_v17 = vpack.c.bf16 %v746_v16, %v746_v16 }
 0x10f   : > { %v847_v19 = vunpack.c.l.b16 %v750_v17  ;;  %v792_v20 = vsel %vm787_vm2, %v750_v17, 0 }
 0x110   : > { %801 = vmatpush.bf16.xpose.msra.mxu3 %v792_v20 }
 0x111   : > { %v848_v21 = vpack.c.b16 %v847_v19, %v847_v19 }
 0x113   : > { %948 = vrot.lane.b32.xlu2 %v848_v21, %s1861_s21  ;;  %849 = vrot.lane.b32.xlu1 %v848_v21, %s1862_s29 }
 0x114   : > { %v748_v23 = vpop.f32.mrf.mxu1 }
 0x115   : > { %v907_v23 = vld [vmem:[%s2324_s7 + $0x4] sm:$0xf] }
 0x117   : > { %1498 = vmatmul.msk.bf16.vlgmr.msra.gmra.mxu3 %vm787_vm2, %v784_v18 }
 0x11b   : > { %946 = vrot.lane.b32.xlu2 %v843_v24, %s1861_s21  ;;  %844 = vrot.lane.b32.xlu1 %v843_v24, %s1862_s29 }
 0x123   : > { %1024 = vrot.lane.b32.xlu1 %v843_v24, %s1863_s14  ;;  %v912_v24 = vsel %vm822_vm1, %v907_v23, 0 }
 0x124   : > { %921 = vmatpush.bf16.msrb.mxu3 %v912_v24 }
 0x16d   : > { %v949_v25 = vpop.permute.xlu2 %948 }
 0x16e   : > { %v954_v28 = vsel %vm787_vm2, %v949_v25, 0  ;;  %v1003_v25 = vld [vmem:[%s2324_s7 + $0x8] sm:$0xf] }
 0x175   : > { %v947_v34 = vpop.permute.xlu2 %946 }
 0x185   : > { %v850_v26 = vpop.permute.xlu1 %849 }
 0x186   : > { %v855_v27 = vsel %vm787_vm2, %v850_v26, 0  ;;  %v1008_v26 = vsel %vm822_vm1, %v1003_v25, 0 }
 0x187   : > { %864 = vmatpush.bf16.xpose.msra.mxu1 %v855_v27  ;;  %1017 = vmatpush.bf16.msra.mxu3 %v1008_v26 }
 0x18d   : > { %v845_v29 = vpop.permute.xlu1 %844 }
 0x18e   : > { %1500 = vmatmul.msk.bf16.vlgmr.msra.gmra.mxu1 %vm787_vm2, %v845_v29 }
 0x18f   : > { %963 = vmatpush.bf16.xpose.msrb.mxu1 %v954_v28 }
 0x195   : > { %v1025_v55 = vpop.permute.xlu1 %1024 }
 0x19a   : > { %v803_v32 = vpop.f32.mrf.mxu3 }
 0x19b   : > { %v804_v33 = vadd.f32 %v803_v32, %v2170_v31 }
 0x19d   : > { %v807_v35 = vsel %vm787_vm2, %v804_v33, -inf }
 0x19e   : > { %1504 = vmatmul.msk.bf16.vlgmr.msrb.gmra.mxu1 %vm787_vm2, %v947_v34  ;;  %808 = vmax.xlane.f32.xlu0 %v807_v35 }
 0x1a2   : > { %v805_v36 = vpop.f32.mrf.mxu3 }
 0x20b   : > { %v866_v37 = vpop.f32.mrf.mxu1 }
 0x20c   : > { %v867_v38 = vadd.f32 %v866_v37, %v2170_v31 }
 0x20e   : > { %v870_v39 = vsel %vm787_vm2, %v867_v38, -inf }
 0x20f   : > { %871 = vmax.xlane.f32.xlu2 %v870_v39 }
 0x211   : > { %v809_v40 = vpop.xlane.xlu0 %808 }
 0x212   : > { %v810_v41 = vsub.f32 %v804_v33, %v809_v40 }
 0x213   : > { %v868_v42 = vpop.f32.mrf.mxu1 }
 0x214   : > { %v811_v43 = vmul.f32 1.442695, %v810_v41 }
 0x216   : > { %1643 = vpow2.f32 %v811_v43 }
 0x21b   : > { %v965_v44 = vpop.f32.mrf.mxu1 }
 0x21c   : > { %v1644_v45 = vpop.eup %1643  ;;  %v966_v46 = vadd.f32 %v965_v44, %v2170_v31 }
 0x21d   : > { %v813_v47 = vsel %vm787_vm2, %v1644_v45, 0.0 }
 0x21e   : > { %814 = vadd.xlane.f32.xlu0 %v813_v47  ;;  %v969_v48 = vsel %vm787_vm2, %v966_v46, -inf }
 0x21f   : > { %970 = vmax.xlane.f32.xlu1 %v969_v48 }
 0x223   : > { %v967_v49 = vpop.f32.mrf.mxu1 }
 0x232   : > { %1026 = vrot.lane.b32.xlu0 %v848_v21, %s1863_s14 }
 0x282   : > { %v872_v50 = vpop.xlane.xlu2 %871 }
 0x283   : > { %v873_v51 = vsub.f32 %v867_v38, %v872_v50 }
 0x285   : > { %v874_v54 = vmul.f32 1.442695, %v873_v51 }
 0x287   : > { %1645 = vpow2.f32 %v874_v54 }
 0x28d   : > { %v1646_v56 = vpop.eup %1645 }
 0x28e   : > { %v876_v57 = vsel %vm787_vm2, %v1646_v56, 0.0 }
 0x28f   : > { %877 = vadd.xlane.f32.xlu2 %v876_v57 }
 0x291   : > { %v815_v58 = vpop.xlane.xlu0 %814 }
 0x292   : > { %1647 = vrcp.f32 %v815_v58  ;;  %v971_v59 = vpop.xlane.xlu1 %970 }
 0x293   : > { %v972_v60 = vsub.f32 %v966_v46, %v971_v59 }
 0x295   : > { %v973_v61 = vmul.f32 1.442695, %v972_v60 }
 0x297   : > { %1649 = vpow2.f32 %v973_v61  ;;  %v1636_v61 = vld [vmem:[%s2325_s8] ss:$0 sm:$0xff] }
 0x298   : > { %v1648_v62 = vpop.eup %1647 }
 0x299   : > { %v817_v63 = vmul.f32 %v1648_v62, %v1644_v45 }
 0x29b   : > { %v818_v0 = vpack.c.bf16 %v817_v63, %v817_v63  ;;  %v1107_v63 = vunpack.c.l.bf16 %v2145_v6 }
 0x29d   : > { %v1650_v1 = vpop.eup %1649  ;;  %1499 = vmatmul.msk.bf16.vlgmr.msra.gmra.mxu0 %vm787_vm2, %v818_v0 }
 0x29e   : > { %v975_v2 = vsel %vm787_vm2, %v1650_v1, 0.0 }
 0x29f   : > { %976 = vadd.xlane.f32.xlu1 %v975_v2 }
 0x2a4   : > { %v1027_v4 = vpop.permute.xlu0 %1026 }
 0x2a5   : > { %v1032_v7 = vsel %vm787_vm2, %v1027_v4, 0 }
 0x2a6   : > { %1041 = vmatpush.bf16.xpose.msra.mxu0 %v1032_v7 }
 0x2a7   : > { %885 = vrot.lane.b32.xlu2 %v884_v5, %s1862_s29 }
 0x2b8   : > { %981 = vrot.lane.b32.xlu1 %v884_v5, %s1861_s21  ;;  %s2377_s21 = sld [smem:[#allocation30_spill]] }
 0x2be   : > { %v1568_v24 = vld [vmem:[%s2377_s21 + $0x28] sm:$0xff]  ;;  %v1567_v25 = vld [vmem:[%s2377_s21 + $0x20] sm:$0xff] }
 0x302   : > { %v878_v8 = vpop.xlane.xlu2 %877 }
 0x303   : > { %1651 = vrcp.f32 %v878_v8 }
 0x309   : > { %v1652_v9 = vpop.eup %1651 }
 0x30a   : > { %v880_v11 = vmul.f32 %v1652_v9, %v1646_v56  ;;  %v886_v12 = vpop.permute.xlu2 %885  ;;  %v1081_v56 = vld [vmem:[%s2324_s7 + $0xc] sm:$0xf] }
 0x30b   : > { %v891_v13 = vsel %vm822_vm1, %v886_v12, 0  ;;  %v1086_v57 = vsel %vm822_vm1, %v1081_v56, 0 }
 0x30c   : > { %900 = vmatpush.bf16.msrb.mxu2 %v891_v13  ;;  %v881_v14 = vpack.c.bf16 %v880_v11, %v880_v11 }
 0x30f   : > { %1501 = vmatmul.msk.bf16.vlgmr.msrb.gmra.mxu2 %vm787_vm2, %v881_v14 }
 0x312   : > { %v977_v16 = vpop.xlane.xlu1 %976 }
 0x313   : > { %1653 = vrcp.f32 %v977_v16 }
 0x319   : > { %v1654_v18 = vpop.eup %1653 }
 0x31a   : > { %v835_v10 = vpop.f32.mrf.mxu0  ;;  %v979_v19 = vmul.f32 %v1654_v18, %v1650_v1  ;;  %v1561_v18 = vld [vmem:[%s2376_s13] sm:$0xff] }
 0x31b   : > { %v839_v15 = vpack.c.bf16 %v835_v10, %v835_v10 }
 0x31c   : > { %v980_v22 = vpack.c.bf16 %v979_v19, %v979_v19  ;;  %v1570_v19 = vld [vmem:[%s2377_s21 + $0x38] sm:$0xff] }
 0x31d   : > { %1503 = vmatmul.msk.bf16.vlgmr.msrb.gmra.mxu0 %vm787_vm2, %v839_v15 }
 0x31e   : > { %1255 = vmatpush.bf16.msrb.mxu0 %v1570_v19 }
 0x322   : > { %v837_v17 = vpop.f32.mrf.mxu0 }
 0x323   : > { %v1562_v17 = vld [vmem:[%s2376_s13 + $0x8] sm:$0xff] }
 0x32a   : > { %v982_v20 = vpop.permute.xlu1 %981 }
 0x32b   : > { %v987_v21 = vsel %vm822_vm1, %v982_v20, 0 }
 0x32c   : > { %996 = vmatpush.bf16.msra.mxu2 %v987_v21 }
 0x32d   : > { %1507 = vmatmul.msk.bf16.vlgmr.msra.gmra.mxu0 %vm787_vm2, %v1025_v55 }
 0x32f   : > { %1505 = vmatmul.msk.bf16.vlgmr.msra.gmra.mxu2 %vm787_vm2, %v980_v22  ;;  %v1569_v22 = vld [vmem:[%s2377_s21 + $0x30] sm:$0xff] }
 0x330   : > { %1095 = vmatpush.bf16.msrb.mxu2 %v1086_v57  ;;  %1256 = vmatpush.bf16.msrb.mxu0 %v1569_v22 }
 0x334   : > { %1257 = vmatpush.bf16.msrb.mxu0 %v1568_v24 }
 0x338   : > { %1258 = vmatpush.bf16.msrb.mxu0 %v1567_v25 }
 0x392   : > { %v902_v27 = vpop.f32.mrf.mxu2 }
 0x393   : > { %v906_v28 = vpack.c.bf16 %v902_v27, %v902_v27 }
 0x395   : > { %1502 = vmatmul.msk.bf16.vlgmr.msrb.gmra.mxu3 %vm787_vm2, %v906_v28  ;;  %v1566_v28 = vld [vmem:[%s2377_s21 + $0x18] sm:$0xff] }
 0x396   : > { %1178 = vmatpush.bf16.msrb.mxu3 %v1562_v17  ;;  %1259 = vmatpush.bf16.msrb.mxu0 %v1566_v28 }
 0x39a   : > { %v904_v29 = vpop.f32.mrf.mxu2  ;;  %v942_v30 = vpop.f32.mrf.mxu0  ;;  %1179 = vmatpush.bf16.msrb.mxu3 %v1561_v18 }
 0x3a2   : > { %v944_v32 = vpop.f32.mrf.mxu0 }
 0x3a3   : > { %v1565_v32 = vld [vmem:[%s2377_s21 + $0x10] sm:$0xff] }
 0x3a4   : > { %1260 = vmatpush.bf16.msrb.mxu0 %v1565_v32 }
 0x3aa   : > { %v1043_v33 = vpop.f32.mrf.mxu0 }
 0x3ab   : > { %v1044_v34 = vadd.f32 %v1043_v33, %v2170_v31 }
 0x3ad   : > { %v1047_v35 = vsel %vm787_vm2, %v1044_v34, -inf }
 0x3ae   : > { %1048 = vmax.xlane.f32.xlu0 %v1047_v35  ;;  %v1637_v35 = vld [vmem:[%s2378_s12] ss:$0 sm:$0xff]  ;;  %s2382_s12 = sld [smem:[#allocation26_spill]] }
 0x3b2   : > { %v998_v36 = vpop.f32.mrf.mxu2  ;;  %v1045_v37 = vpop.f32.mrf.mxu0 }
 0x3b3   : > { %v1002_v38 = vpack.c.bf16 %v998_v36, %v998_v36  ;;  %v1638_v37 = vld [vmem:[%s2379_s1] ss:$0 sm:$0xff]  ;;  %s2383_s1 = sld [smem:[#allocation32_spill]] }
 0x3b5   : > { %1506 = vmatmul.msk.bf16.vlgmr.msra.gmra.mxu3 %vm787_vm2, %v1002_v38 }
 0x3b9   : > { %s1313_s23 = scalar_lea.hbm %s2383_s1, %s1552_s9  ;;  %s1805_s18 = scalar_lea.hbm %s2383_s1, 16 }
 0x3ba   : > { %v1000_v39 = vpop.f32.mrf.mxu2 }
 0x418   : > { %v923_v40 = vpop.f32.mrf.mxu3 }
 0x419   : > { %v943_v31 = vadd.f32 %v942_v30, %v923_v40 }
 0x420   : > { %v925_v41 = vpop.f32.mrf.mxu3 }
 0x421   : > { %v1049_v42 = vpop.xlane.xlu0 %1048 }
 0x422   : > { %v1050_v43 = vsub.f32 %v1044_v34, %v1049_v42  ;;  %v1564_v42 = vld [vmem:[%s2377_s21 + $0x8] sm:$0xff] }
 0x423   : > { %1261 = vmatpush.bf16.msrb.mxu0 %v1564_v42 }
 0x424   : > { %v1051_v44 = vmul.f32 1.442695, %v1050_v43  ;;  %v1563_v43 = vld [vmem:[%s2377_s21] sm:$0xff] }
 0x426   : > { %1655 = vpow2.f32 %v1051_v44  ;;  %v1639_v44 = vld [vmem:[%s2380_s24] ss:$0 sm:$0xff]  ;;  %s1317_s24 = sshll.u32 %s1313_s23, 4  ;;  %s1318_s24 = int_to_ptr.hbm [resolvable:$true] %s1317_s24 }
 0x427   : > { %1262 = vmatpush.bf16.msrb.mxu0 %v1563_v43  ;;  %s1799_s26 = sshra.s32 %s1318_s24, 4  ;;  %s1800_s26 = int_to_ptr.hbm [resolvable:$true] %s1799_s26 }
 0x428   : > { %p1806_p3 = scmp.lt.s32.totalorder %s1800_s26, %s2383_s1 }
 0x42c   : > { %v1656_v45 = vpop.eup %1655 }
 0x42d   : > { %v1053_v46 = vsel %vm787_vm2, %v1656_v45, 0.0 }
 0x42e   : > { %1054 = vadd.xlane.f32.xlu0 %v1053_v46 }
 0x438   : > { %v1019_v47 = vpop.f32.mrf.mxu3 }
 0x439   : > { %v1023_v48 = vadd.f32 %v1019_v47, %v943_v31 }
 0x440   : > { %v1021_v49 = vpop.f32.mrf.mxu3 }
 0x441   : > { %v1640_v49 = vld [vmem:[%s2381_s17] ss:$0 sm:$0xff]  ;;  %s1801_s17 = scalar_lea.hbm %s1800_s26, 8 }
 0x442   : > { %1059 = vrot.lane.b32.xlu0 %v884_v5, %s1863_s14  ;;  %v1864_v5 = vmov 32.0   ;;  %p1802_p6 = scmp.ne.s32.totalorder %s1800_s26, %s1801_s17  ;;  %p1807_p4 = scmp.lt.s32.totalorder %s1805_s18, %s1801_s17 }
 0x444   : > { %p1803_p13 = pnand %p1802_p6, %p2001_p11  ;;  %p1808_p5 = por %p1807_p4, %p1806_p3 }
 0x446   : > { %p1804_p2 = pneg %p1803_p13 }
 0x448   : > { %p1809_p7 = pnand %p1808_p5, %p1804_p2 }
 0x4a1   : > { %v1055_v50 = vpop.xlane.xlu0 %1054 }
 0x4a2   : > { %1657 = vrcp.f32 %v1055_v50 }
 0x4a3   : > { %1659 = vrcp.f32 %v1864_v5  ;;  %v1641_v5 = vld [vmem:[%s2382_s12] ss:$0 sm:$0xff] }
 0x4a8   : > { %v1658_v51 = vpop.eup %1657 }
 0x4a9   : > { %v1057_v52 = vmul.f32 %v1658_v51, %v1656_v45  ;;  %v1660_v7 = vpop.eup %1659 }
 0x4aa   : > { %v1113_v8 = vmul.f32 32.0, %v1660_v7  ;;  %vm1117_vm3 = vweird.f32 %v1660_v7 }
 0x4ab   : > { %v1058_v55 = vpack.c.bf16 %v1057_v52, %v1057_v52 }
 0x4ac   : > { %v1114_v9 = vsub.f32 1.0, %v1113_v8 }
 0x4ae   : > { %v1115_v11 = vmul.f32 %v1660_v7, %v1114_v9  ;;  %v1642_v9 = vld [vmem:[%s2385_s30] ss:$0 sm:$0xff] }
 0x4b0   : > { %v1116_v12 = vadd.f32 %v1660_v7, %v1115_v11 }
 0x4b2   : > { %v2224_v13 = vsel %vm1117_vm3, %v1660_v7, %v1116_v12 }
 0x4b4   : > { %v1060_v53 = vpop.permute.xlu0 %1059 }
 0x4b5   : > { %v1065_v54 = vsel %vm822_vm1, %v1060_v53, 0 }
 0x4b6   : > { %1074 = vmatpush.bf16.msra.mxu1 %v1065_v54 }
 0x4b9   : > { %1508 = vmatmul.msk.bf16.vlgmr.msra.gmra.mxu1 %vm787_vm2, %v1058_v55 }
 0x536   : > { %v1076_v58 = vpop.f32.mrf.mxu1 }
 0x537   : > { %v1080_v59 = vpack.c.bf16 %v1076_v58, %v1076_v58 }
 0x539   : > { %1509 = vmatmul.msk.bf16.vlgmr.msrb.gmra.mxu2 %vm787_vm2, %v1080_v59 }
 0x53e   : > { %v1078_v60 = vpop.f32.mrf.mxu1 }
 0x5bc   : > { %v1097_v62 = vpop.f32.mrf.mxu2 }
 0x5bd   : > { %v1101_v0 = vadd.f32 %v1097_v62, %v1023_v48 }
 0x5bf   : > { %v1106_v1 = vadd.f32 %v1636_v61, %v1101_v0 }
 0x5c1   : > { %v1108_v2 = vadd.f32 %v1107_v63, %v1106_v1 }
 0x5c3   : > { %v1109_v3 = vsel %vm700_vm0, %v1108_v2, 0.0 }
 0x5c4   : > { %1110 = vadd.xlane.f32.xlu2 %v1109_v3  ;;  %v1099_v4 = vpop.f32.mrf.mxu2 }
 0x637   : > { %v1111_v14 = vpop.xlane.xlu2 %1110 }
 0x638   : > { %v1119_v6 = vmul.f32 %v2224_v13, %v1111_v14 }
 0x63a   : > { %v1120_v10 = vsub.f32 %v1108_v2, %v1119_v6 }
 0x63c   : > { %v1121_v15 = vmul.f32 %v1120_v10, %v1120_v10 }
 0x63e   : > { %v1122_v16 = vsel %vm700_vm0, %v1121_v15, 0.0 }
 0x63f   : > { %1123 = vadd.xlane.f32.xlu1 %v1122_v16 }
 0x6b2   : > { %v1124_v20 = vpop.xlane.xlu1 %1123 }
 0x6b3   : > { %v1125_v21 = vmul.f32 %v1124_v20, %v2224_v13 }
 0x6b5   : > { %v1126_v23 = vadd.f32 1e-05, %v1125_v21 }
 0x6b7   : > { %1661 = vrsqrt.f32 %v1126_v23  ;;  %vm1133_vm5 = vweird.f32 %v1126_v23 }
 0x6bd   : > { %v1662_v26 = vpop.eup %1661 }
 0x6be   : > { %v1128_v27 = vmul.f32 %v1662_v26, %v1126_v23  ;;  %vm1134_vm4 = vweird.f32 %v1662_v26 }
 0x6bf   : > { %vm1135_vm6 = vmor %vm1133_vm5, %vm1134_vm4 }
 0x6c0   : > { %v1129_v29 = vmul.f32 %v1662_v26, %v1128_v27 }
 0x6c2   : > { %v1130_v30 = vmul.f32 0.5, %v1129_v29 }
 0x6c4   : > { %v1131_v33 = vsub.f32 1.5, %v1130_v30 }
 0x6c6   : > { %v1132_v34 = vmul.f32 %v1662_v26, %v1131_v33 }
 0x6c8   : > { %v1136_v36 = vsel %vm1135_vm6, %v1662_v26, %v1132_v34 }
 0x6c9   : > { %v1137_v38 = vmul.f32 %v1136_v36, %v1120_v10 }
 0x6cb   : > { %v1142_v39 = vmul.f32 %v1637_v35, %v1137_v38 }
 0x6cd   : > { %v1147_v40 = vadd.f32 %v1638_v37, %v1142_v39 }
 0x6cf   : > { %v1148_v41 = vpack.c.bf16 %v1147_v40, %v1147_v40 }
 0x6d1   : > { %1518 = vmatmul.msk.bf16.vlgmr.msrb.gmra.mxu3 %vm700_vm0, %v1148_v41 }
 0x754   : > { %v1181_v45 = vpop.f32.mrf.mxu3 }
 0x755   : > { %v1182_v46 = vadd.f32 %v1639_v44, %v1181_v45 }
 0x757   : > { %v1185_v31 = vmax.f32 %v1182_v46, 0.0 }
 0x759   : > { %v1186_v47 = vpack.c.bf16 %v1185_v31, %v1185_v31 }
 0x75b   : > { %1263 = vmatmul.bf16.vlgmr.msrb.gmra.mxu0 %v1186_v47 }
 0x75c   : > { %v1183_v48 = vpop.f32.mrf.mxu3 }
 0x7d8   : > { %v1264_v50 = vpop.f32.mrf.mxu0 }
 0x7d9   : > { %v1265_v51 = vadd.f32 %v1640_v49, %v1264_v50 }
 0x7db   : > { %v1268_v52 = vadd.f32 %v1265_v51, %v1147_v40 }
 0x7dd   : > { %v1269_v53 = vsel %vm700_vm0, %v1268_v52, 0.0 }
 0x7de   : > { %1270 = vadd.xlane.f32.xlu0 %v1269_v53 }
 0x7e0   : > { %v1266_v54 = vpop.f32.mrf.mxu0 }
 0x851   : > { %v1271_v55 = vpop.xlane.xlu0 %1270 }
 0x852   : > { %v1272_v56 = vmul.f32 %v1271_v55, %v2224_v13 }
 0x854   : > { %v1273_v57 = vsub.f32 %v1268_v52, %v1272_v56 }
 0x856   : > { %v1274_v58 = vmul.f32 %v1273_v57, %v1273_v57 }
 0x858   : > { %v1275_v59 = vsel %vm700_vm0, %v1274_v58, 0.0 }
 0x859   : > { %1276 = vadd.xlane.f32.xlu2 %v1275_v59 }
 0x8cc   : > { %v1277_v60 = vpop.xlane.xlu2 %1276 }
 0x8cd   : > { %v1278_v61 = vmul.f32 %v1277_v60, %v2224_v13 }
 0x8cf   : > { %v1279_v62 = vadd.f32 1e-05, %v1278_v61 }
 0x8d1   : > { %1663 = vrsqrt.f32 %v1279_v62  ;;  %vm1286_vm8 = vweird.f32 %v1279_v62 }
 0x8d7   : > { %v1664_v63 = vpop.eup %1663 }
 0x8d8   : > { %v1281_v0 = vmul.f32 %v1664_v63, %v1279_v62  ;;  %vm1287_vm7 = vweird.f32 %v1664_v63 }
 0x8d9   : > { %vm1288_vm9 = vmor %vm1286_vm8, %vm1287_vm7 }
 0x8da   : > { %v1282_v1 = vmul.f32 %v1664_v63, %v1281_v0 }
 0x8dc   : > { %v1283_v2 = vmul.f32 0.5, %v1282_v1 }
 0x8de   : > { %v1284_v3 = vsub.f32 1.5, %v1283_v2 }
 0x8e0   : > { %v1285_v4 = vmul.f32 %v1664_v63, %v1284_v3 }
 0x8e2   : > { %v1289_v7 = vsel %vm1288_vm9, %v1664_v63, %v1285_v4 }
 0x8e3   : > { %v1290_v8 = vmul.f32 %v1289_v7, %v1273_v57 }
 0x8e5   : > { %v1295_v11 = vmul.f32 %v1641_v5, %v1290_v8 }
 0x8e7   : > { %v1300_v12 = vadd.f32 %v1642_v9, %v1295_v11 }
 0x8e9   : > { %1301 = vst.msk [vmem:[%s679_s28] sm:$0xff] %vm700_vm0, %v1300_v12 }
 0x8ea   : > { %1812 = shalt.err (!%p1809_p7)
}
 0x8eb   : > { %1579 = dma.vmem_to_hbm [thread:$0]  (%p2001_p11), %s1316_s27, 128, %s1318_s24, %s1303_s19  }
 0x8ec PF: > { %s2386_s22 = sld [smem:[#allocation15_spill]]  ;;  %p1595_p0 = pnand %p1456_p9, %p2005_p12 }
 0x8ee   : > { %p1596_p8 = pneg %p1595_p0 }
 0x8f2   : > { %s1329_s23 = sand.u32 1, %s2386_s22  }
 0x8f3   : > { %s1330_s29 = scalar_lea.sflag [#allocation4], %s1329_s23 }
 0x8f4   : > { %1842 = dma.done.wait (%p1596_p8), %s1330_s29, 128  }
 0x8f5   : > { %1844 = vsyncadd (%p1596_p8), %s1330_s29, 4294967168  ;;  %s2389_s27 = sld [smem:[#allocation18_spill]]  ;;  %s2392_s24 = smov %s1851_s25 }
 0x8f6   : > { %s2390_s14 = sld [smem:[#allocation16_spill]] }
 0x8f7   : > { %s2391_s26 = sld [smem:[#allocation19_spill]] }
 0x8fb   : > { %p36_p10 = scmp.ge.s32.totalorder %s2389_s27, 4  }
 0x8fc   : > { %s2393_s25 = smov %s2390_s14 }
 0x8fd   :  { %38 = sbr.rel (!%p36_p10) target bundleno = 21 (0x15), region = 170 }
 0x902   :  { %1336 = vsyncpa [#allocation3], 1 }
 0x903   :  { %1338 = vsyncpa [#allocation3 + $0x1], 1 }
 0x904   :  { %1339 = vsyncpa [#allocation6], 1 }
 0x905   :  { %1341 = vsyncpa [#allocation6 + $0x1], 1 }
 0x906   :  { %1342 = vsyncpa [#allocation9], 1 }
 0x907   :  { %1344 = vsyncpa [#allocation9 + $0x1], 1 }
 0x908   :  { %1345 = vsyncpa [#allocation4], 1 }
 0x909   :  { %1347 = vsyncpa [#allocation4 + $0x1], 1 }

</bundles_post_ra>
